<compile_context>
chip_gen: v7x
topology: tpu7x:2x2x1
jax: 0.10.0
libtpu: 0.0.40
codegen_flags: <defaults>
</compile_context>

<pallas_src>
from functools import partial

import jax
import jax.numpy as jnp
from jax.experimental import pallas as pl
from jax.experimental.pallas import tpu as pltpu

HIDDEN_CHANNELS = 128
IN_CHANNELS = 768
OUT_CHANNELS = 1


# ---------------------------------------------------------------------------
# Fused Pallas kernel: sage1 -> relu -> sage2 -> relu -> mean_pool -> linear
# ---------------------------------------------------------------------------
def _sage_fused_kernel(a_ref, inv_deg_ref, p_ref, x_ref,
                       wcat1_ref, bl1_ref,
                       wcat2_ref, bl2_ref,
                       wlin_ref, blin_ref,
                       o_ref):
    H = HIDDEN_CHANNELS
    a = a_ref[...]                       # (Np, Np) bf16, raw edge counts (exact small ints)
    inv_deg = inv_deg_ref[...]           # (Np, 1)  f32, 1/max(deg,1)
    x = x_ref[...]                       # (Np, Fin) bf16

    # ---- SAGEConv 1 + ReLU:  h1 = relu(mean_agg(X W_l1) + X W_r1 + b1) ----
    # One wide matmul against [W_l1 | W_r1]; split at the lane-aligned 128
    # boundary (no tile-crossing slice).  Mean = (counts @ .) * inv_deg.
    xw1 = jnp.dot(x, wcat1_ref[...], preferred_element_type=jnp.float32)      # (Np, 2H)
    agg1 = jnp.dot(a, xw1[:, :H].astype(jnp.bfloat16),
                   preferred_element_type=jnp.float32) * inv_deg              # (Np, H)
    h1 = jnp.maximum(agg1 + xw1[:, H:] + bl1_ref[...], 0.0)                   # f32

    # ---- SAGEConv 2 + ReLU ----
    xw2 = jnp.dot(h1.astype(jnp.bfloat16), wcat2_ref[...],
                  preferred_element_type=jnp.float32)                         # (Np, 2H)
    agg2 = jnp.dot(a, xw2[:, :H].astype(jnp.bfloat16),
                   preferred_element_type=jnp.float32) * inv_deg
    h2 = jnp.maximum(agg2 + xw2[:, H:] + bl2_ref[...], 0.0)                   # (Np, H) f32

    # ---- global_mean_pool + final Linear ----
    # P is tiny (G, Np) and kept f32 so 1/|graph| is exact; padded node
    # columns are zero so their (garbage) h2 rows do not contribute.
    pooled = jnp.dot(p_ref[...], h2, preferred_element_type=jnp.float32)      # (G, H) f32
    # OUT_CHANNELS == 1: VPU multiply + lane reduction instead of a degenerate
    # 1-lane MXU matmul; b_lin read as a scalar from SMEM.
    o_ref[...] = (jnp.sum(pooled * wlin_ref[...], axis=-1, keepdims=True)
                  + blin_ref[0, 0])


# ---------------------------------------------------------------------------
# Parameter init (raw f32, matches torch init style) + one-time kernel prep
# ---------------------------------------------------------------------------
def init_params(key):
    ks = jax.random.split(key, 6)

    def glorot(k, fan_in, fan_out):
        lim = (6.0 / (fan_in + fan_out)) ** 0.5
        return jax.random.uniform(k, (fan_in, fan_out), jnp.float32, -lim, lim)

    return {
        # sage1: SAGEConv(IN_CHANNELS, HIDDEN_CHANNELS)  (lin_l bias, lin_r no bias)
        "w_l1": glorot(ks[0], IN_CHANNELS, HIDDEN_CHANNELS),
        "w_r1": glorot(ks[1], IN_CHANNELS, HIDDEN_CHANNELS),
        "b_l1": jnp.zeros((1, HIDDEN_CHANNELS), jnp.float32),
        # sage2: SAGEConv(HIDDEN_CHANNELS, HIDDEN_CHANNELS)
        "w_l2": glorot(ks[2], HIDDEN_CHANNELS, HIDDEN_CHANNELS),
        "w_r2": glorot(ks[3], HIDDEN_CHANNELS, HIDDEN_CHANNELS),
        "b_l2": jnp.zeros((1, HIDDEN_CHANNELS), jnp.float32),
        # lin: Linear(HIDDEN_CHANNELS, OUT_CHANNELS)
        "w_lin": glorot(ks[4], HIDDEN_CHANNELS, OUT_CHANNELS),
        "b_lin": jax.random.uniform(ks[5], (1, OUT_CHANNELS), jnp.float32,
                                    -0.05, 0.05),
    }


def prepare_params(params):
    """One-time weight prep (hoisted out of the per-call path)."""
    return {
        "wcat1": jnp.concatenate([params["w_l1"], params["w_r1"]],
                                 axis=1).astype(jnp.bfloat16),      # (Fin, 2H)
        "b_l1": params["b_l1"],                                     # (1, H) f32
        "wcat2": jnp.concatenate([params["w_l2"], params["w_r2"]],
                                 axis=1).astype(jnp.bfloat16),      # (H, 2H)
        "b_l2": params["b_l2"],                                     # (1, H) f32
        "w_lin_row": params["w_lin"].T,                             # (1, H) f32 (VPU)
        "b_lin": params["b_lin"].reshape(1, 1),                     # (1, 1) f32 (SMEM)
    }


# ---------------------------------------------------------------------------
# Graph-operator construction (plain JAX) with lane-dense node padding
# ---------------------------------------------------------------------------
def build_operators(x, edge_index, batch, num_nodes, num_nodes_padded, num_graphs):
    """Padded dense operators.

    A[i, j]     = #edges j->i (exact small ints, bf16)     (PyG mean agg numerator)
    inv_deg[i]  = 1 / max(deg(i), 1)                        (f32, exact divide)
    P[g, n]     = 1/|graph g| if node n in graph g else 0   (f32)
    Padded nodes: zero adjacency rows/cols, zero pool columns, zero features.
    """
    pad = num_nodes_padded - num_nodes
    src, dst = edge_index[0], edge_index[1]

    counts = jnp.zeros((num_nodes_padded, num_nodes_padded),
                       jnp.float32).at[dst, src].add(1.0)
    deg = counts.sum(axis=1, keepdims=True)
    inv_deg = 1.0 / jnp.maximum(deg, 1.0)          # isolated/padded nodes -> agg 0
    a = counts.astype(jnp.bfloat16)

    batch_p = jnp.pad(batch, (0, pad), constant_values=-1)   # padded nodes in no graph
    one_hot = (batch_p[None, :] == jnp.arange(num_graphs)[:, None]).astype(jnp.float32)
    gcnt = one_hot.sum(axis=1, keepdims=True)
    p = one_hot / jnp.maximum(gcnt, 1.0)

    x_p = jnp.pad(x, ((0, pad), (0, 0))).astype(jnp.bfloat16)
    return a, inv_deg, p, x_p


def _vmem_limit_bytes(n_pad, num_graphs):
    h, f = HIDDEN_CHANNELS, IN_CHANNELS
    est = (2 * n_pad * n_pad                  # A bf16
           + 2 * n_pad * f                    # X bf16
           + 4 * n_pad                        # inv_deg f32
           + 4 * num_graphs * n_pad           # P f32
           + 2 * f * 2 * h + 2 * h * 2 * h    # wcat1, wcat2 bf16
           + 4 * n_pad * 2 * h * 2            # xw1, xw2 f32
           + 4 * n_pad * h * 4                # agg1, h1, agg2, h2 f32
           + 2 * n_pad * 2 * h)               # bf16 staging for MXU
    # 2x headroom; floor at 32 MiB, cap at 64 MiB so the setting is legal on
    # v7x as well (raise toward ~100 MiB on v5e/v6e for very large N).
    return max(min(2 * est + (4 << 20), 64 << 20), 32 << 20)


@partial(jax.jit, static_argnames=("num_graphs",))
def sage_forward(prep, x, edge_index, batch, num_graphs):
    n = x.shape[0]
    n_pad = ((n + 127) // 128) * 128   # lane-dense A / MXU-friendly K for A@xw
    a, inv_deg, p, x_p = build_operators(x, edge_index, batch, n, n_pad, num_graphs)

    vmem_specs = [pl.BlockSpec(memory_space=pltpu.MemorySpace.VMEM)
                  for _ in range(9)]
    smem_spec = pl.BlockSpec(memory_space=pltpu.MemorySpace.SMEM)

    out = pl.pallas_call(
        _sage_fused_kernel,
        out_shape=jax.ShapeDtypeStruct((num_graphs, OUT_CHANNELS), jnp.float32),
        in_specs=vmem_specs + [smem_spec],
        out_specs=pl.BlockSpec(memory_space=pltpu.MemorySpace.VMEM),
        compiler_params=pltpu.CompilerParams(
            vmem_limit_bytes=_vmem_limit_bytes(n_pad, num_graphs)),
    )(a, inv_deg, p, x_p,
      prep["wcat1"], prep["b_l1"],
      prep["wcat2"], prep["b_l2"],
      prep["w_lin_row"], prep["b_lin"])
    return out  # [num_graphs, OUT_CHANNELS]


# ---------------------------------------------------------------------------
# Pure-JAX f32 reference (mirrors the PyTorch module in eval mode)
# ---------------------------------------------------------------------------
def sage_reference(params, x, edge_index, batch, num_graphs):
    n = x.shape[0]
    src, dst = edge_index[0], edge_index[1]
    adj = jnp.zeros((n, n), jnp.float32).at[dst, src].add(1.0)
    a = adj / jnp.maximum(adj.sum(axis=1, keepdims=True), 1.0)

    def sage(xx, wl, wr, bl):
        return a @ (xx @ wl) + xx @ wr + bl

    h1 = jax.nn.relu(sage(x, params["w_l1"], params["w_r1"], params["b_l1"]))
    h2 = jax.nn.relu(sage(h1, params["w_l2"], params["w_r2"], params["b_l2"]))
    one_hot = (batch[None, :] == jnp.arange(num_graphs)[:, None]).astype(jnp.float32)
    pooled = (one_hot @ h2) / jnp.maximum(one_hot.sum(axis=1, keepdims=True), 1.0)
    return pooled @ params["w_lin"] + params["b_lin"]


# ---------------------------------------------------------------------------
if __name__ == "__main__":
    key = jax.random.PRNGKey(0)
    k_param, k_x, k_edge = jax.random.split(key, 3)

    NUM_NODES = 64
    NUM_EDGES = 256
    NUM_GRAPHS = 2

    params = init_params(k_param)
    prep = prepare_params(params)            # one-time weight prep (hoisted)

    x = jax.random.normal(k_x, (NUM_NODES, IN_CHANNELS), jnp.float32)
    edge_index = jax.random.randint(k_edge, (2, NUM_EDGES), 0, NUM_NODES,
                                    dtype=jnp.int32)
    # first half of the nodes -> graph 0, second half -> graph 1
    batch = jnp.concatenate([
        jnp.zeros((NUM_NODES // 2,), jnp.int32),
        jnp.ones((NUM_NODES - NUM_NODES // 2,), jnp.int32),
    ])

    out = sage_forward(prep, x, edge_index, batch, NUM_GRAPHS)
    out = jax.block_until_ready(out)
    assert out.shape == (NUM_GRAPHS, OUT_CHANNELS), out.shape
    assert bool(jnp.all(jnp.isfinite(out)))

    # bf16 MXU inputs with f32 accumulation -> expect ~1e-2 relative error
    ref = sage_reference(params, x, edge_index, batch, NUM_GRAPHS)
    assert bool(jnp.allclose(out, ref, rtol=5e-2, atol=5e-2)), (out, ref)

    print("KERNEL_OK")
</pallas_src>

<mosaic_0001>
module attributes {stable_mosaic.version = 11 : i64} {
  func.func private @main(%arg0: i32) attributes {dimension_semantics = [#tpu.dimension_semantics<core_parallel>], iteration_bounds = array<i64: 2>, tpu.core_type = #tpu.core_type<sc_scalar_subcore>, window_params = []} {
    return
  }
}

module attributes {stable_mosaic.version = 11 : i64} {
  func.func private @main(%arg0: i32) attributes {dimension_semantics = [#tpu.dimension_semantics<core_parallel>], iteration_bounds = array<i64: 2>, tpu.core_type = #tpu.core_type<sc_scalar_subcore>, window_params = []} {
    return
  }
}

module attributes {stable_mosaic.version = 11 : i64} {
  func.func @_sage_fused_kernel(%arg0: memref<128x128xbf16, #tpu.memory_space<vmem>>, %arg1: memref<128x1xf32, #tpu.memory_space<vmem>>, %arg2: memref<2x128xf32, #tpu.memory_space<vmem>>, %arg3: memref<128x768xbf16, #tpu.memory_space<vmem>>, %arg4: memref<768x256xbf16, #tpu.memory_space<vmem>>, %arg5: memref<1x128xf32, #tpu.memory_space<vmem>>, %arg6: memref<128x256xbf16, #tpu.memory_space<vmem>>, %arg7: memref<1x128xf32, #tpu.memory_space<vmem>>, %arg8: memref<1x128xf32, #tpu.memory_space<vmem>>, %arg9: memref<1x1xf32, #tpu.memory_space<smem>>, %arg10: memref<2x1xf32, #tpu.memory_space<vmem>>) attributes {dimension_semantics = [], scalar_prefetch = 0 : i64, scratch_operands = 0 : i64, tpu.core_type = #tpu.core_type<tc>} {
    %c0 = arith.constant 0 : index
    %c0_0 = arith.constant 0 : index
    %0 = vector.load %arg0[%c0, %c0_0] : memref<128x128xbf16, #tpu.memory_space<vmem>>, vector<128x128xbf16>
    %c0_1 = arith.constant 0 : index
    %c0_2 = arith.constant 0 : index
    %1 = vector.load %arg1[%c0_1, %c0_2] : memref<128x1xf32, #tpu.memory_space<vmem>>, vector<128x1xf32>
    %c0_3 = arith.constant 0 : index
    %c0_4 = arith.constant 0 : index
    %2 = vector.load %arg3[%c0_3, %c0_4] : memref<128x768xbf16, #tpu.memory_space<vmem>>, vector<128x768xbf16>
    %c0_5 = arith.constant 0 : index
    %c0_6 = arith.constant 0 : index
    %3 = vector.load %arg4[%c0_5, %c0_6] : memref<768x256xbf16, #tpu.memory_space<vmem>>, vector<768x256xbf16>
    %cst = arith.constant dense<0.000000e+00> : vector<128x256xf32>
    %4 = tpu.matmul %2, %3, %cst {dimension_numbers = #tpu.dot_dimension_numbers<[1], [0], [0], [1], [0, 0, 1, 1], [], []>} : vector<128x768xbf16>, vector<768x256xbf16>, vector<128x256xf32> -> vector<128x256xf32>
    %5 = vector.extract_strided_slice %4 {offsets = [0, 0], sizes = [128, 128], strides = [1, 1]} : vector<128x256xf32> to vector<128x128xf32>
    %6 = arith.truncf %5 : vector<128x128xf32> to vector<128x128xbf16>
    %cst_7 = arith.constant dense<0.000000e+00> : vector<128x128xf32>
    %7 = tpu.matmul %0, %6, %cst_7 {dimension_numbers = #tpu.dot_dimension_numbers<[1], [0], [0], [1], [0, 0, 1, 1], [], []>} : vector<128x128xbf16>, vector<128x128xbf16>, vector<128x128xf32> -> vector<128x128xf32>
    %8 = vector.broadcast %1 : vector<128x1xf32> to vector<128x128xf32>
    %9 = arith.mulf %7, %8 : vector<128x128xf32>
    %10 = vector.extract_strided_slice %4 {offsets = [0, 128], sizes = [128, 128], strides = [1, 1]} : vector<128x256xf32> to vector<128x128xf32>
    %11 = arith.addf %9, %10 : vector<128x128xf32>
    %c0_8 = arith.constant 0 : index
    %c0_9 = arith.constant 0 : index
    %12 = vector.load %arg5[%c0_8, %c0_9] : memref<1x128xf32, #tpu.memory_space<vmem>>, vector<1x128xf32>
    %13 = vector.broadcast %12 : vector<1x128xf32> to vector<128x128xf32>
    %14 = arith.addf %11, %13 : vector<128x128xf32>
    %cst_10 = arith.constant 0.000000e+00 : f32
    %15 = vector.broadcast %cst_10 : f32 to vector<128x128xf32>
    %16 = arith.maximumf %14, %15 : vector<128x128xf32>
    %17 = arith.truncf %16 : vector<128x128xf32> to vector<128x128xbf16>
    %c0_11 = arith.constant 0 : index
    %c0_12 = arith.constant 0 : index
    %18 = vector.load %arg6[%c0_11, %c0_12] : memref<128x256xbf16, #tpu.memory_space<vmem>>, vector<128x256xbf16>
    %cst_13 = arith.constant dense<0.000000e+00> : vector<128x256xf32>
    %19 = tpu.matmul %17, %18, %cst_13 {dimension_numbers = #tpu.dot_dimension_numbers<[1], [0], [0], [1], [0, 0, 1, 1], [], []>} : vector<128x128xbf16>, vector<128x256xbf16>, vector<128x256xf32> -> vector<128x256xf32>
    %20 = vector.extract_strided_slice %19 {offsets = [0, 0], sizes = [128, 128], strides = [1, 1]} : vector<128x256xf32> to vector<128x128xf32>
    %21 = arith.truncf %20 : vector<128x128xf32> to vector<128x128xbf16>
    %cst_14 = arith.constant dense<0.000000e+00> : vector<128x128xf32>
    %22 = tpu.matmul %0, %21, %cst_14 {dimension_numbers = #tpu.dot_dimension_numbers<[1], [0], [0], [1], [0, 0, 1, 1], [], []>} : vector<128x128xbf16>, vector<128x128xbf16>, vector<128x128xf32> -> vector<128x128xf32>
    %23 = vector.broadcast %1 : vector<128x1xf32> to vector<128x128xf32>
    %24 = arith.mulf %22, %23 : vector<128x128xf32>
    %25 = vector.extract_strided_slice %19 {offsets = [0, 128], sizes = [128, 128], strides = [1, 1]} : vector<128x256xf32> to vector<128x128xf32>
    %26 = arith.addf %24, %25 : vector<128x128xf32>
    %c0_15 = arith.constant 0 : index
    %c0_16 = arith.constant 0 : index
    %27 = vector.load %arg7[%c0_15, %c0_16] : memref<1x128xf32, #tpu.memory_space<vmem>>, vector<1x128xf32>
    %28 = vector.broadcast %27 : vector<1x128xf32> to vector<128x128xf32>
    %29 = arith.addf %26, %28 : vector<128x128xf32>
    %cst_17 = arith.constant 0.000000e+00 : f32
    %30 = vector.broadcast %cst_17 : f32 to vector<128x128xf32>
    %31 = arith.maximumf %29, %30 : vector<128x128xf32>
    %c0_18 = arith.constant 0 : index
    %c0_19 = arith.constant 0 : index
    %32 = vector.load %arg2[%c0_18, %c0_19] : memref<2x128xf32, #tpu.memory_space<vmem>>, vector<2x128xf32>
    %cst_20 = arith.constant dense<0.000000e+00> : vector<2x128xf32>
    %33 = tpu.matmul %32, %31, %cst_20 {dimension_numbers = #tpu.dot_dimension_numbers<[1], [0], [0], [1], [0, 0, 1, 1], [], []>} : vector<2x128xf32>, vector<128x128xf32>, vector<2x128xf32> -> vector<2x128xf32>
    %c0_21 = arith.constant 0 : index
    %c0_22 = arith.constant 0 : index
    %34 = vector.load %arg8[%c0_21, %c0_22] : memref<1x128xf32, #tpu.memory_space<vmem>>, vector<1x128xf32>
    %35 = vector.broadcast %34 : vector<1x128xf32> to vector<2x128xf32>
    %36 = arith.mulf %33, %35 : vector<2x128xf32>
    %cst_23 = arith.constant dense<0.000000e+00> : vector<2xf32>
    %37 = vector.multi_reduction <add>, %36, %cst_23 [1] : vector<2x128xf32> to vector<2xf32>
    %38 = vector.shape_cast %37 : vector<2xf32> to vector<2x1xf32>
    %c0_24 = arith.constant 0 : index
    %c0_25 = arith.constant 0 : index
    %39 = memref.load %arg9[%c0_24, %c0_25] : memref<1x1xf32, #tpu.memory_space<smem>>
    %40 = vector.broadcast %39 : f32 to vector<2x1xf32>
    %41 = arith.addf %38, %40 : vector<2x1xf32>
    %c0_26 = arith.constant 0 : index
    %c0_27 = arith.constant 0 : index
    %42 = vector.load %arg10[%c0_26, %c0_27] : memref<2x1xf32, #tpu.memory_space<vmem>>, vector<2x1xf32>
    tpu.vector_store %arg10[%c0_26, %c0_27], %41 {strides = array<i32>} : memref<2x1xf32, #tpu.memory_space<vmem>>, vector<2x1xf32>,
    return
  }
}

</mosaic_0001>

<bundles_post_ra>
// kernel: sage_forward.1
= control target key start
LH: loop header
LB: loop body
LE: loop exit
PB: predicated region body
PF: predicated region fallthrough
CT: control target
= control target key end

     0   :  { %vm2756_vm0 = vmmov 0   ;;  %vm2048_vm1 = vcmask 1041408   ;;  %vm2055_vm2 = vcmask 1024   ;;  %s3781_s4 = inlined_call_operand.vmem [shape: bf16[768,256], index: 4, kind: input, shape index: {}]   ;;  %s3782_s3 = inlined_call_operand.vmem [shape: bf16[128,768], index: 3, kind: input, shape index: {}]   ;;  %s3783_s0 = inlined_call_operand.vmem [shape: bf16[128,128], index: 0, kind: input, shape index: {}]   ;;  %s3784_s1 = inlined_call_operand.vmem [shape: f32[128,1], index: 1, kind: input, shape index: {}]   ;;  %s3785_s6 = inlined_call_operand.vmem [shape: bf16[128,256], index: 6, kind: input, shape index: {}]   ;;  %s3786_s5 = inlined_call_operand.vmem [shape: f32[1,128], index: 5, kind: input, shape index: {}]   ;;  %s3787_s7 = inlined_call_operand.vmem [shape: f32[1,128], index: 7, kind: input, shape index: {}]   ;;  %s3788_s2 = inlined_call_operand.vmem [shape: f32[2,128], index: 2, kind: input, shape index: {}]   ;;  %s3789_s8 = inlined_call_operand.vmem [shape: f32[1,128], index: 8, kind: input, shape index: {}]   ;;  %s3790_s9 = inlined_call_operand.<no memory space> [shape: f32[1,1], index: 9, kind: input, shape index: {}]   ;;  %s3791_s10 = inlined_call_operand.vmem [shape: f32[2,1], index: 10, kind: output, shape index: {}]  }
   0x1   :  { %v2506_v0 = vld [vmem:[%s3781_s4 + $0x4] ss:$8 sps:$4 sm:$0xff]   ;;  %v2508_v1 = vld [vmem:[%s3781_s4] ss:$8 sps:$4 sm:$0xff]   ;;  %v2509_v2 = vld [vmem:[%s3781_s4 + $0x14] ss:$8 sps:$4 sm:$0xff]  }
   0x2   :  { %933 = vmatprep.subr.bf16.mxu0 %v2506_v0  ;;  %v2511_v3 = vld [vmem:[%s3781_s4 + $0x10] ss:$8 sps:$4 sm:$0xff]   ;;  %v2512_v4 = vld [vmem:[%s3781_s4 + $0x24] ss:$8 sps:$4 sm:$0xff]   ;;  %v2514_v5 = vld [vmem:[%s3781_s4 + $0x20] ss:$8 sps:$4 sm:$0xff]  }
   0x3   :  { %934 = vmatpush1.bf16.msra.mxu0 %v2508_v1  ;;  %v2515_v6 = vld [vmem:[%s3781_s4 + $0x34] ss:$8 sps:$4 sm:$0xff]   ;;  %v2517_v7 = vld [vmem:[%s3781_s4 + $0x30] ss:$8 sps:$4 sm:$0xff]   ;;  %v2518_v8 = vld [vmem:[%s3781_s4 + $0x44] ss:$8 sps:$4 sm:$0xff]  }
   0x4   :  { %935 = vmatprep.subr.bf16.mxu0 %v2509_v2  ;;  %v2520_v9 = vld [vmem:[%s3781_s4 + $0x40] ss:$8 sps:$4 sm:$0xff]   ;;  %v2521_v10 = vld [vmem:[%s3781_s4 + $0x54] ss:$8 sps:$4 sm:$0xff]   ;;  %v2523_v11 = vld [vmem:[%s3781_s4 + $0x50] ss:$8 sps:$4 sm:$0xff]  }
   0x5   :  { %v2524_v12 = vld [vmem:[%s3781_s4 + $0x64] ss:$8 sps:$4 sm:$0xff]   ;;  %v2526_v14 = vld [vmem:[%s3781_s4 + $0x60] ss:$8 sps:$4 sm:$0xff]   ;;  %v2527_v15 = vld [vmem:[%s3781_s4 + $0x74] ss:$8 sps:$4 sm:$0xff]  }
   0x6   :  { %v2556_v13 = vld [vmem:[%s3782_s3 + $0x4] ss:$24 sps:$4 sm:$0xff]   ;;  %v2529_v16 = vld [vmem:[%s3781_s4 + $0x70] ss:$8 sps:$4 sm:$0xff]   ;;  %v2532_v18 = vld [vmem:[%s3781_s4 + $0x80] ss:$8 sps:$4 sm:$0xff]  }
   0x7   :  { %936 = vmatpush1.bf16.msra.mxu0 %v2511_v3  ;;  %965 = vmatprep.mubr.bf16.mxu0 %v2556_v13  ;;  %v2530_v17 = vld [vmem:[%s3781_s4 + $0x84] ss:$8 sps:$4 sm:$0xff]   ;;  %v2533_v19 = vld [vmem:[%s3781_s4 + $0x94] ss:$8 sps:$4 sm:$0xff]   ;;  %v2535_v20 = vld [vmem:[%s3781_s4 + $0x90] ss:$8 sps:$4 sm:$0xff]  }
   0x8   :  { %937 = vmatprep.subr.bf16.mxu0 %v2512_v4  ;;  %v2536_v21 = vld [vmem:[%s3781_s4 + $0xa4] ss:$8 sps:$4 sm:$0xff]   ;;  %v2538_v22 = vld [vmem:[%s3781_s4 + $0xa0] ss:$8 sps:$4 sm:$0xff]   ;;  %v2539_v23 = vld [vmem:[%s3781_s4 + $0xb4] ss:$8 sps:$4 sm:$0xff]  }
   0x9   :  { %v2888_v24 = vld [vmem:[%s3781_s4 + $0x204] ss:$8 sps:$4 sm:$0xff]   ;;  %v2893_v25 = vld [vmem:[%s3781_s4 + $0x200] ss:$8 sps:$4 sm:$0xff]   ;;  %v2541_v26 = vld [vmem:[%s3781_s4 + $0xb0] ss:$8 sps:$4 sm:$0xff]  }
   0xa   :  { %2404 = vmatprep.subr.bf16.mxu1 %v2888_v24  ;;  %v2903_v27 = vld [vmem:[%s3781_s4 + $0x214] ss:$8 sps:$4 sm:$0xff]   ;;  %v2908_v28 = vld [vmem:[%s3781_s4 + $0x210] ss:$8 sps:$4 sm:$0xff]   ;;  %v2542_v29 = vld [vmem:[%s3781_s4 + $0xc4] ss:$8 sps:$4 sm:$0xff]  }
   0xb   :  { %938 = vmatpush1.bf16.msra.mxu0 %v2514_v5  ;;  %2420 = vmatpush1.bf16.msra.mxu1 %v2893_v25  ;;  %v2544_v30 = vld [vmem:[%s3781_s4 + $0xc0] ss:$8 sps:$4 sm:$0xff]   ;;  %v2921_v31 = vld [vmem:[%s3781_s4 + $0x224] ss:$8 sps:$4 sm:$0xff]   ;;  %v2545_v33 = vld [vmem:[%s3781_s4 + $0xd4] ss:$8 sps:$4 sm:$0xff]  }
   0xc   :  { %939 = vmatprep.subr.bf16.mxu0 %v2515_v6  ;;  %2405 = vmatprep.subr.bf16.mxu1 %v2903_v27  ;;  %v2926_v32 = vld [vmem:[%s3781_s4 + $0x220] ss:$8 sps:$4 sm:$0xff]   ;;  %v2935_v34 = vld [vmem:[%s3781_s4 + $0x234] ss:$8 sps:$4 sm:$0xff]   ;;  %v2547_v35 = vld [vmem:[%s3781_s4 + $0xd0] ss:$8 sps:$4 sm:$0xff]  }
   0xd   :  { %v2944_v36 = vld [vmem:[%s3781_s4 + $0x230] ss:$8 sps:$4 sm:$0xff]   ;;  %v2548_v37 = vld [vmem:[%s3781_s4 + $0xe4] ss:$8 sps:$4 sm:$0xff]   ;;  %v2550_v38 = vld [vmem:[%s3781_s4 + $0xe0] ss:$8 sps:$4 sm:$0xff]  }
   0xe   :  { %v2956_v39 = vld [vmem:[%s3781_s4 + $0x244] ss:$8 sps:$4 sm:$0xff]   ;;  %v2551_v40 = vld [vmem:[%s3781_s4 + $0xf4] ss:$8 sps:$4 sm:$0xff]   ;;  %v2965_v41 = vld [vmem:[%s3781_s4 + $0x240] ss:$8 sps:$4 sm:$0xff]  }
   0xf   :  { %940 = vmatpush1.bf16.msra.mxu0 %v2517_v7  ;;  %2421 = vmatpush1.bf16.msra.mxu1 %v2908_v28  ;;  %v2971_v42 = vld [vmem:[%s3781_s4 + $0x254] ss:$8 sps:$4 sm:$0xff]   ;;  %v2553_v43 = vld [vmem:[%s3781_s4 + $0xf0] ss:$8 sps:$4 sm:$0xff]   ;;  %v2559_v44 = vld [vmem:[%s3781_s4 + $0x104] ss:$8 sps:$4 sm:$0xff]  }
  0x10   :  { %941 = vmatprep.subr.bf16.mxu0 %v2518_v8  ;;  %2406 = vmatprep.subr.bf16.mxu1 %v2921_v31  ;;  %v2983_v45 = vld [vmem:[%s3781_s4 + $0x250] ss:$8 sps:$4 sm:$0xff]   ;;  %v2989_v46 = vld [vmem:[%s3781_s4 + $0x264] ss:$8 sps:$4 sm:$0xff]   ;;  %v2557_v48 = vld [vmem:[%s3781_s4 + $0x100] ss:$8 sps:$4 sm:$0xff]  }
  0x11   :  { %v2554_v47 = vld [vmem:[%s3782_s3] ss:$24 sps:$4 sm:$0xff]   ;;  %v2562_v49 = vld [vmem:[%s3781_s4 + $0x114] ss:$8 sps:$4 sm:$0xff]   ;;  %v2568_v54 = vld [vmem:[%s3781_s4 + $0x124] ss:$8 sps:$4 sm:$0xff]  }
  0x12   :  { %v2563_v50 = vld [vmem:[%s3782_s3 + $0x34] ss:$24 sps:$4 sm:$0xff]   ;;  %v3008_v51 = vld [vmem:[%s3781_s4 + $0x260] ss:$8 sps:$4 sm:$0xff]   ;;  %v2560_v53 = vld [vmem:[%s3781_s4 + $0x110] ss:$8 sps:$4 sm:$0xff]  }
  0x13   :  { %942 = vmatpush1.bf16.msra.mxu0 %v2520_v9  ;;  %2422 = vmatpush1.bf16.msra.mxu1 %v2926_v32  ;;  %v3013_v52 = vld [vmem:[%s3781_s4 + $0x274] ss:$8 sps:$4 sm:$0xff]   ;;  %v3025_v55 = vld [vmem:[%s3781_s4 + $0x270] ss:$8 sps:$4 sm:$0xff]   ;;  %v3031_v56 = vld [vmem:[%s3781_s4 + $0x284] ss:$8 sps:$4 sm:$0xff]  }
  0x14   :  { %943 = vmatprep.subr.bf16.mxu0 %v2521_v10  ;;  %2407 = vmatprep.subr.bf16.mxu1 %v2935_v34  ;;  %v2565_v57 = vld [vmem:[%s3782_s3 + $0x30] ss:$24 sps:$4 sm:$0xff]   ;;  %v2571_v59 = vld [vmem:[%s3781_s4 + $0x134] ss:$8 sps:$4 sm:$0xff]   ;;  %v2577_v0 = vld [vmem:[%s3781_s4 + $0x144] ss:$8 sps:$4 sm:$0xff]  }
  0x15   :  { %v2566_v58 = vld [vmem:[%s3781_s4 + $0x120] ss:$8 sps:$4 sm:$0xff]   ;;  %v2572_v60 = vld [vmem:[%s3782_s3 + $0x64] ss:$24 sps:$4 sm:$0xff]   ;;  %v2569_v63 = vld [vmem:[%s3781_s4 + $0x130] ss:$8 sps:$4 sm:$0xff]  }
  0x16   :  { %v3049_v61 = vld [vmem:[%s3781_s4 + $0x280] ss:$8 sps:$4 sm:$0xff]   ;;  %v3055_v62 = vld [vmem:[%s3781_s4 + $0x294] ss:$8 sps:$4 sm:$0xff]   ;;  %v3067_v1 = vld [vmem:[%s3781_s4 + $0x290] ss:$8 sps:$4 sm:$0xff]  }
  0x17   :  { %944 = vmatpush1.bf16.msra.mxu0 %v2523_v11  ;;  %2423 = vmatpush1.bf16.msra.mxu1 %v2944_v36  ;;  %v3073_v2 = vld [vmem:[%s3781_s4 + $0x2a4] ss:$8 sps:$4 sm:$0xff]   ;;  %v2574_v3 = vld [vmem:[%s3782_s3 + $0x60] ss:$24 sps:$4 sm:$0xff]   ;;  %v2580_v5 = vld [vmem:[%s3781_s4 + $0x154] ss:$8 sps:$4 sm:$0xff]  }
  0x18   :  { %945 = vmatprep.subr.bf16.mxu0 %v2524_v12  ;;  %2408 = vmatprep.subr.bf16.mxu1 %v2956_v39  ;;  %v2575_v4 = vld [vmem:[%s3781_s4 + $0x140] ss:$8 sps:$4 sm:$0xff]   ;;  %v2581_v6 = vld [vmem:[%s3782_s3 + $0x94] ss:$24 sps:$4 sm:$0xff]   ;;  %v2578_v10 = vld [vmem:[%s3781_s4 + $0x150] ss:$8 sps:$4 sm:$0xff]  }
  0x19   :  { %v3091_v7 = vld [vmem:[%s3781_s4 + $0x2a0] ss:$8 sps:$4 sm:$0xff]   ;;  %v3097_v8 = vld [vmem:[%s3781_s4 + $0x2b4] ss:$8 sps:$4 sm:$0xff]   ;;  %v2586_v11 = vld [vmem:[%s3781_s4 + $0x164] ss:$8 sps:$4 sm:$0xff]  }
  0x1a   :  { %v2690_v9 = vld [vmem:[%s3782_s3 + $0xd4] ss:$24 sps:$4 sm:$0xff]   ;;  %v3112_v12 = vld [vmem:[%s3781_s4 + $0x2b0] ss:$8 sps:$4 sm:$0xff]  }
  0x1b   :  { %946 = vmatpush1.bf16.msra.mxu0 %v2526_v14  ;;  %2424 = vmatpush1.bf16.msra.mxu1 %v2965_v41  ;;  %v3118_v13 = vld [vmem:[%s3781_s4 + $0x2c4] ss:$8 sps:$4 sm:$0xff]   ;;  %v2583_v14 = vld [vmem:[%s3782_s3 + $0x90] ss:$24 sps:$4 sm:$0xff]  }
  0x1c   :  { %947 = vmatprep.subr.bf16.mxu0 %v2527_v15  ;;  %2409 = vmatprep.subr.bf16.mxu1 %v2971_v42  ;;  %v2584_v15 = vld [vmem:[%s3781_s4 + $0x160] ss:$8 sps:$4 sm:$0xff]  }
  0x1d   :  { %1231 = vmatprep.mubr.bf16.mxu1 %v2690_v9  ;;  %v2638_v9 = vld [vmem:[%s3781_s4 + $0x1e0] ss:$8 sps:$4 sm:$0xff]  }
  0x1f   :  { %948 = vmatpush1.bf16.msra.mxu0 %v2529_v16  ;;  %2425 = vmatpush1.bf16.msra.mxu1 %v2983_v45  ;;  %v2589_v16 = vld [vmem:[%s3781_s4 + $0x174] ss:$8 sps:$4 sm:$0xff]  }
  0x20   :  { %949 = vmatprep.subr.bf16.mxu0 %v2530_v17  ;;  %2410 = vmatprep.subr.bf16.mxu1 %v2989_v46  ;;  %v2590_v17 = vld [vmem:[%s3782_s3 + $0xc4] ss:$24 sps:$4 sm:$0xff]  }
  0x23   :  { %950 = vmatpush1.bf16.msra.mxu0 %v2532_v18  ;;  %2426 = vmatpush1.bf16.msra.mxu1 %v3008_v51  ;;  %v3136_v18 = vld [vmem:[%s3781_s4 + $0x2c0] ss:$8 sps:$4 sm:$0xff]  }
  0x24   :  { %951 = vmatprep.subr.bf16.mxu0 %v2533_v19  ;;  %2411 = vmatprep.subr.bf16.mxu1 %v3013_v52  ;;  %v3142_v19 = vld [vmem:[%s3781_s4 + $0x2d4] ss:$8 sps:$4 sm:$0xff]  }
  0x27   :  { %952 = vmatpush1.bf16.msra.mxu0 %v2535_v20  ;;  %2427 = vmatpush1.bf16.msra.mxu1 %v3025_v55  ;;  %v2587_v20 = vld [vmem:[%s3781_s4 + $0x170] ss:$8 sps:$4 sm:$0xff]  }
  0x28   :  { %953 = vmatprep.subr.bf16.mxu0 %v2536_v21  ;;  %2412 = vmatprep.subr.bf16.mxu1 %v3031_v56  ;;  %v2595_v21 = vld [vmem:[%s3781_s4 + $0x184] ss:$8 sps:$4 sm:$0xff]  }
  0x2b   :  { %954 = vmatpush1.bf16.msra.mxu0 %v2538_v22  ;;  %2428 = vmatpush1.bf16.msra.mxu1 %v3049_v61  ;;  %v3154_v22 = vld [vmem:[%s3781_s4 + $0x2d0] ss:$8 sps:$4 sm:$0xff]  }
  0x2c   :  { %955 = vmatprep.subr.bf16.mxu0 %v2539_v23  ;;  %2413 = vmatprep.subr.bf16.mxu1 %v3055_v62  ;;  %v3160_v23 = vld [vmem:[%s3781_s4 + $0x2e4] ss:$8 sps:$4 sm:$0xff]  }
  0x2f   :  { %956 = vmatpush1.bf16.msra.mxu0 %v2541_v26  ;;  %2429 = vmatpush1.bf16.msra.mxu1 %v3067_v1  ;;  %v2592_v26 = vld [vmem:[%s3782_s3 + $0xc0] ss:$24 sps:$4 sm:$0xff]  }
  0x30   :  { %957 = vmatprep.subr.bf16.mxu0 %v2542_v29  ;;  %2414 = vmatprep.subr.bf16.mxu1 %v3073_v2  ;;  %v2593_v29 = vld [vmem:[%s3781_s4 + $0x180] ss:$8 sps:$4 sm:$0xff]  }
  0x33   :  { %958 = vmatpush1.bf16.msra.mxu0 %v2544_v30  ;;  %2430 = vmatpush1.bf16.msra.mxu1 %v3091_v7  ;;  %v2605_v30 = vld [vmem:[%s3782_s3 + $0xf4] ss:$24 sps:$4 sm:$0xff]  }
  0x34   :  { %959 = vmatprep.subr.bf16.mxu0 %v2545_v33  ;;  %2415 = vmatprep.subr.bf16.mxu1 %v3097_v8  ;;  %v2601_v33 = vld [vmem:[%s3781_s4 + $0x194] ss:$8 sps:$4 sm:$0xff]  }
  0x37   :  { %960 = vmatpush1.bf16.msra.mxu0 %v2547_v35  ;;  %2431 = vmatpush1.bf16.msra.mxu1 %v3112_v12  ;;  %v3178_v35 = vld [vmem:[%s3781_s4 + $0x2e0] ss:$8 sps:$4 sm:$0xff]  }
  0x38   :  { %961 = vmatprep.subr.bf16.mxu0 %v2548_v37  ;;  %2416 = vmatprep.subr.bf16.mxu1 %v3118_v13  ;;  %v3184_v37 = vld [vmem:[%s3781_s4 + $0x2f4] ss:$8 sps:$4 sm:$0xff]  }
  0x3b   :  { %962 = vmatpush1.bf16.msra.mxu0 %v2550_v38  ;;  %2432 = vmatpush1.bf16.msra.mxu1 %v3136_v18  ;;  %v2599_v38 = vld [vmem:[%s3781_s4 + $0x190] ss:$8 sps:$4 sm:$0xff]  }
  0x3c   :  { %963 = vmatprep.subr.bf16.mxu0 %v2551_v40  ;;  %2417 = vmatprep.subr.bf16.mxu1 %v3142_v19  ;;  %v2610_v40 = vld [vmem:[%s3781_s4 + $0x1a4] ss:$8 sps:$4 sm:$0xff]  }
  0x3f   :  { %964 = vmatpush1.bf16.msra.mxu0 %v2553_v43  ;;  %2433 = vmatpush1.bf16.msra.mxu1 %v3154_v22  ;;  %v3196_v43 = vld [vmem:[%s3781_s4 + $0x2f0] ss:$8 sps:$4 sm:$0xff]  }
  0x40   :  { %1046 = vmatprep.subr.bf16.mxu0 %v2559_v44  ;;  %2418 = vmatprep.subr.bf16.mxu1 %v3160_v23  ;;  %v2607_v44 = vld [vmem:[%s3782_s3 + $0xf0] ss:$24 sps:$4 sm:$0xff]  }
  0x42   :  { %966 = vmatmul.mubr.bf16.vlgmr.msra.gmra.mrb[0].mxu0 %v2554_v47  ;;  %v2608_v47 = vld [vmem:[%s3781_s4 + $0x1a0] ss:$8 sps:$4 sm:$0xff]  }
  0x43   :  { %1047 = vmatpush1.bf16.msra.mxu0 %v2557_v48  ;;  %975 = vmatprep.mubr.bf16.mxu0 %v2563_v50  ;;  %v2620_v48 = vld [vmem:[%s3782_s3 + $0x124] ss:$24 sps:$4 sm:$0xff]   ;;  %v2688_v50 = vld [vmem:[%s3782_s3 + $0xd0] ss:$24 sps:$4 sm:$0xff]  }
  0x44   :  { %1048 = vmatprep.subr.bf16.mxu0 %v2562_v49  ;;  %2434 = vmatpush1.bf16.msra.mxu1 %v3178_v35  ;;  %v2616_v49 = vld [vmem:[%s3781_s4 + $0x1b4] ss:$8 sps:$4 sm:$0xff]  }
  0x45   :  { %2419 = vmatprep.subr.bf16.mxu1 %v3184_v37 }
  0x47   :  { %1049 = vmatpush1.bf16.msra.mxu0 %v2560_v53  ;;  %v2694_v53 = vld [vmem:[%s3782_s3 + $0x104] ss:$24 sps:$4 sm:$0xff]  }
  0x48   :  { %1050 = vmatprep.subr.bf16.mxu0 %v2568_v54  ;;  %2435 = vmatpush1.bf16.msra.mxu1 %v3196_v43  ;;  %v2614_v54 = vld [vmem:[%s3781_s4 + $0x1b0] ss:$8 sps:$4 sm:$0xff]  }
  0x4a   :  { %976 = vmatmul.mubr.bf16.gmra.mrb[4].mxu0 %v2565_v57  ;;  %v2625_v57 = vld [vmem:[%s3781_s4 + $0x1c4] ss:$8 sps:$4 sm:$0xff]  }
  0x4b   :  { %1051 = vmatpush1.bf16.msra.mxu0 %v2566_v58  ;;  %985 = vmatprep.mubr.bf16.mxu0 %v2572_v60  ;;  %v2622_v58 = vld [vmem:[%s3782_s3 + $0x120] ss:$24 sps:$4 sm:$0xff]   ;;  %v2635_v60 = vld [vmem:[%s3782_s3 + $0x154] ss:$24 sps:$4 sm:$0xff]  }
  0x4c   :  { %1052 = vmatprep.subr.bf16.mxu0 %v2571_v59  ;;  %1232 = vmatmul.mubr.bf16.vlgmr.msra.gmra.mrb[0].mxu1 %v2688_v50  ;;  %v2623_v59 = vld [vmem:[%s3781_s4 + $0x1c0] ss:$8 sps:$4 sm:$0xff]   ;;  %v56_v50 = vld [vmem:[%s3784_s1 + $0x18] sm:$0xff] }
  0x4d   :  { %1241 = vmatprep.mubr.bf16.mxu1 %v2694_v53  ;;  %v57_v53 = vld [vmem:[%s3784_s1 + $0x20] sm:$0xff] }
  0x4f   :  { %1053 = vmatpush1.bf16.msra.mxu0 %v2569_v63  ;;  %v2631_v63 = vld [vmem:[%s3781_s4 + $0x1d4] ss:$8 sps:$4 sm:$0xff]  }
  0x50   :  { %1054 = vmatprep.subr.bf16.mxu0 %v2577_v0  ;;  %v2697_v0 = vld [vmem:[%s3782_s3 + $0x100] ss:$24 sps:$4 sm:$0xff]  }
  0x52   :  { %986 = vmatmul.mubr.bf16.gmra.mrb[8].mxu0 %v2574_v3  ;;  %v2700_v3 = vld [vmem:[%s3782_s3 + $0x134] ss:$24 sps:$4 sm:$0xff]  }
  0x53   :  { %1055 = vmatpush1.bf16.msra.mxu0 %v2575_v4  ;;  %995 = vmatprep.mubr.bf16.mxu0 %v2581_v6  ;;  %v2629_v4 = vld [vmem:[%s3781_s4 + $0x1d0] ss:$8 sps:$4 sm:$0xff]  }
  0x54   :  { %1056 = vmatprep.subr.bf16.mxu0 %v2580_v5  ;;  %v2640_v5 = vld [vmem:[%s3781_s4 + $0x1e4] ss:$8 sps:$4 sm:$0xff]   ;;  %1242 = vmatmul.mubr.bf16.gmra.mrb[4].mxu1 %v2697_v0  ;;  %v2637_v6 = vld [vmem:[%s3782_s3 + $0x150] ss:$24 sps:$4 sm:$0xff]   ;;  %v64_v0 = vld [vmem:[%s3784_s1 + $0x58] sm:$0xff] }
  0x55   :  { %1251 = vmatprep.mubr.bf16.mxu1 %v2700_v3 }
  0x57   :  { %1057 = vmatpush1.bf16.msra.mxu0 %v2578_v10  ;;  %v2652_v10 = vld [vmem:[%s3782_s3 + $0xc] ss:$24 sps:$4 sm:$0xff]  }
  0x58   :  { %1058 = vmatprep.subr.bf16.mxu0 %v2586_v11  ;;  %v2646_v11 = vld [vmem:[%s3781_s4 + $0x1f4] ss:$8 sps:$4 sm:$0xff]  }
  0x5a   :  { %996 = vmatmul.mubr.bf16.gmra.mrb[12].mxu0 %v2583_v14  ;;  %v2703_v14 = vld [vmem:[%s3782_s3 + $0x130] ss:$24 sps:$4 sm:$0xff]  }
  0x5b   :  { %1059 = vmatpush1.bf16.msra.mxu0 %v2584_v15  ;;  %1005 = vmatprep.mubr.bf16.mxu0 %v2590_v17  ;;  %v2706_v15 = vld [vmem:[%s3782_s3 + $0x164] ss:$24 sps:$4 sm:$0xff]   ;;  %v2650_v17 = vld [vmem:[%s3782_s3 + $0x8] ss:$24 sps:$4 sm:$0xff]  }
  0x5c   :  { %1060 = vmatprep.subr.bf16.mxu0 %v2589_v16  ;;  %v2644_v16 = vld [vmem:[%s3781_s4 + $0x1f0] ss:$8 sps:$4 sm:$0xff]   ;;  %1252 = vmatmul.mubr.bf16.gmra.mrb[8].mxu1 %v2703_v14 }
  0x5d   :  { %1261 = vmatprep.mubr.bf16.mxu1 %v2706_v15 }
  0x5f   :  { %1061 = vmatpush1.bf16.msra.mxu0 %v2587_v20  ;;  %v2659_v20 = vld [vmem:[%s3782_s3 + $0x3c] ss:$24 sps:$4 sm:$0xff]  }
  0x60   :  { %1062 = vmatprep.subr.bf16.mxu0 %v2595_v21  ;;  %v2709_v21 = vld [vmem:[%s3782_s3 + $0x160] ss:$24 sps:$4 sm:$0xff]  }
  0x62   :  { %1006 = vmatmul.mubr.bf16.gmra.mrb[16].mxu0 %v2592_v26  ;;  %v2661_v26 = vld [vmem:[%s3782_s3 + $0x38] ss:$24 sps:$4 sm:$0xff]  }
  0x63   :  { %1063 = vmatpush1.bf16.msra.mxu0 %v2593_v29  ;;  %1015 = vmatprep.mubr.bf16.mxu0 %v2605_v30 }
  0x64   :  { %1064 = vmatprep.subr.bf16.mxu0 %v2601_v33  ;;  %1262 = vmatmul.mubr.bf16.gmra.mrb[12].mxu1 %v2709_v21 }
  0x67   :  { %1065 = vmatpush1.bf16.msra.mxu0 %v2599_v38 }
  0x68   :  { %1066 = vmatprep.subr.bf16.mxu0 %v2610_v40 }
  0x6a   :  { %1016 = vmatmul.mubr.bf16.gmra.mrb[20].mxu0 %v2607_v44  ;;  %v2754_v44 = vmov 0  }
  0x6b   :  { %1067 = vmatpush1.bf16.msra.mxu0 %v2608_v47  ;;  %1025 = vmatprep.mubr.bf16.mxu0 %v2620_v48  ;;  %v53_v47 = vld [vmem:[%s3784_s1] sm:$0xff]  ;;  %v55_v48 = vld [vmem:[%s3784_s1 + $0x10] sm:$0xff] }
  0x6c   :  { %1068 = vmatprep.subr.bf16.mxu0 %v2616_v49  ;;  %2504 = vset.pattern.permute.xlu0 %v2754_v44  ;;  %v54_v49 = vld [vmem:[%s3784_s1 + $0x8] sm:$0xff] }
  0x6d   :  { %2505 = vset.pattern.permute.xlu1 %v2754_v44  ;;  %1427 = vperm.xlu0 %2504, %v53_v47  }
  0x6e   :  { %1437 = vperm.xlu1 %2505, %v55_v48  }
  0x6f   :  { %1069 = vmatpush1.bf16.msra.mxu0 %v2614_v54  ;;  %v58_v54 = vld [vmem:[%s3784_s1 + $0x28] sm:$0xff] }
  0x70   :  { %1070 = vmatprep.subr.bf16.mxu0 %v2625_v57  ;;  %v59_v57 = vld [vmem:[%s3784_s1 + $0x30] sm:$0xff] }
  0x71   :  { %1432 = vperm.xlu0 %2504, %v54_v49  }
  0x72   :  { %1026 = vmatmul.mubr.bf16.gmra.mrb[24].mxu0 %v2622_v58  ;;  %1442 = vperm.xlu1 %2505, %v56_v50   ;;  %v60_v58 = vld [vmem:[%s3784_s1 + $0x38] sm:$0xff] }
  0x73   :  { %1071 = vmatpush1.bf16.msra.mxu0 %v2623_v59  ;;  %1035 = vmatprep.mubr.bf16.mxu0 %v2635_v60  ;;  %v61_v59 = vld [vmem:[%s3784_s1 + $0x40] sm:$0xff]  ;;  %v62_v60 = vld [vmem:[%s3784_s1 + $0x48] sm:$0xff] }
  0x74   :  { %1072 = vmatprep.subr.bf16.mxu0 %v2631_v63  ;;  %v63_v63 = vld [vmem:[%s3784_s1 + $0x50] sm:$0xff] }
  0x75   :  { %1447 = vperm.xlu0 %2504, %v57_v53  }
  0x76   :  { %1452 = vperm.xlu1 %2505, %v58_v54  }
  0x77   :  { %1073 = vmatpush1.bf16.msra.mxu0 %v2629_v4  ;;  %v65_v4 = vld [vmem:[%s3784_s1 + $0x60] sm:$0xff] }
  0x78   :  { %1074 = vmatprep.subr.bf16.mxu0 %v2640_v5  ;;  %v66_v5 = vld [vmem:[%s3784_s1 + $0x68] sm:$0xff] }
  0x79   :  { %1457 = vperm.xlu0 %2504, %v59_v57  }
  0x7a   :  { %1036 = vmatmul.mubr.bf16.gmra.mrb[28].mxu0 %v2637_v6  ;;  %1462 = vperm.xlu1 %2505, %v60_v58  }
  0x7b   :  { %1075 = vmatpush1.bf16.msra.mxu0 %v2638_v9  ;;  %1078 = vmatprep.mubr.bf16.mxu0 %v2652_v10 }
  0x7c   :  { %1076 = vmatprep.subr.bf16.mxu0 %v2646_v11 }
  0x7d   :  { %1467 = vperm.xlu0 %2504, %v61_v59  }
  0x7e   :  { %1472 = vperm.xlu1 %2505, %v62_v60  }
  0x7f   :  { %1077 = vmatpush1.bf16.msra.mxu0 %v2644_v16 }
  0x80   :  { %1159 = vmatprep.subr.bf16.mxu0 %v2888_v24  ;;  %v2668_v24 = vld [vmem:[%s3782_s3 + $0x6c] ss:$24 sps:$4 sm:$0xff]  }
  0x81   :  { %1477 = vperm.xlu0 %2504, %v63_v63   ;;  %v2732_v63 = vld [vmem:[%s3785_s6 + $0x4] ss:$8 sps:$4 sm:$0xff]  }
  0x82   :  { %1079 = vmatmul.mubr.bf16.vlgmr.msra.gmra.mrb[0].mxu0 %v2650_v17  ;;  %1482 = vperm.xlu1 %2505, %v64_v0   ;;  %v67_v17 = vld [vmem:[%s3784_s1 + $0x70] sm:$0xff]  ;;  %v3491_v0 = vld [vmem:[%s3783_s0 + $0x8] sm:$0xff]  }
  0x83   :  { %1160 = vmatpush1.bf16.msra.mxu0 %v2893_v25  ;;  %1088 = vmatprep.mubr.bf16.mxu0 %v2659_v20  ;;  %v2670_v25 = vld [vmem:[%s3782_s3 + $0x68] ss:$24 sps:$4 sm:$0xff]   ;;  %v68_v20 = vld [vmem:[%s3784_s1 + $0x78] sm:$0xff] }
  0x84   :  { %1161 = vmatprep.subr.bf16.mxu0 %v2903_v27  ;;  %v2677_v27 = vld [vmem:[%s3782_s3 + $0x9c] ss:$24 sps:$4 sm:$0xff]  }
  0x85   :  { %1487 = vperm.xlu0 %2504, %v65_v4   ;;  %v2730_v4 = vld [vmem:[%s3785_s6] ss:$8 sps:$4 sm:$0xff]  }
  0x86   :  { %1492 = vperm.xlu1 %2505, %v66_v5   ;;  %v2735_v5 = vld [vmem:[%s3785_s6 + $0x14] ss:$8 sps:$4 sm:$0xff]  }
  0x87   :  { %1162 = vmatpush1.bf16.msra.mxu0 %v2908_v28  ;;  %v2679_v28 = vld [vmem:[%s3782_s3 + $0x98] ss:$24 sps:$4 sm:$0xff]  }
  0x88   :  { %1163 = vmatprep.subr.bf16.mxu0 %v2921_v31  ;;  %v2686_v31 = vld [vmem:[%s3782_s3 + $0xcc] ss:$24 sps:$4 sm:$0xff]  }
  0x89   :  { %1497 = vperm.xlu0 %2504, %v67_v17   ;;  %v2741_v17 = vld [vmem:[%s3785_s6 + $0x34] ss:$8 sps:$4 sm:$0xff]  }
  0x8a   :  { %1089 = vmatmul.mubr.bf16.gmra.mrb[4].mxu0 %v2661_v26  ;;  %1502 = vperm.xlu1 %2505, %v68_v20   ;;  %v2739_v20 = vld [vmem:[%s3785_s6 + $0x30] ss:$8 sps:$4 sm:$0xff]  }
  0x8b   :  { %1164 = vmatpush1.bf16.msra.mxu0 %v2926_v32  ;;  %1098 = vmatprep.mubr.bf16.mxu0 %v2668_v24  ;;  %v2691_v32 = vld [vmem:[%s3782_s3 + $0xc8] ss:$24 sps:$4 sm:$0xff]  }
  0x8c   :  { %1165 = vmatprep.subr.bf16.mxu0 %v2935_v34  ;;  %v2692_v34 = vld [vmem:[%s3782_s3 + $0xfc] ss:$24 sps:$4 sm:$0xff]  }
  0x8f   :  { %1166 = vmatpush1.bf16.msra.mxu0 %v2944_v36  ;;  %v2696_v36 = vld [vmem:[%s3782_s3 + $0xf8] ss:$24 sps:$4 sm:$0xff]  }
  0x90   :  { %1167 = vmatprep.subr.bf16.mxu0 %v2956_v39  ;;  %v2698_v39 = vld [vmem:[%s3782_s3 + $0x12c] ss:$24 sps:$4 sm:$0xff]  }
  0x92   :  { %1099 = vmatmul.mubr.bf16.gmra.mrb[8].mxu0 %v2670_v25 }
  0x93   :  { %1168 = vmatpush1.bf16.msra.mxu0 %v2965_v41  ;;  %1108 = vmatprep.mubr.bf16.mxu0 %v2677_v27  ;;  %v2702_v41 = vld [vmem:[%s3782_s3 + $0x128] ss:$24 sps:$4 sm:$0xff]  }
  0x94   :  { %1169 = vmatprep.subr.bf16.mxu0 %v2971_v42  ;;  %v2704_v42 = vld [vmem:[%s3782_s3 + $0x15c] ss:$24 sps:$4 sm:$0xff]  }
  0x97   :  { %1170 = vmatpush1.bf16.msra.mxu0 %v2983_v45  ;;  %v2708_v45 = vld [vmem:[%s3782_s3 + $0x158] ss:$24 sps:$4 sm:$0xff]  }
  0x98   :  { %1171 = vmatprep.subr.bf16.mxu0 %v2989_v46  ;;  %v2712_v46 = vld [vmem:[%s3782_s3 + $0x14] ss:$24 sps:$4 sm:$0xff]  }
  0x9a   :  { %1109 = vmatmul.mubr.bf16.gmra.mrb[12].mxu0 %v2679_v28 }
  0x9b   :  { %1172 = vmatpush1.bf16.msra.mxu0 %v3008_v51  ;;  %1118 = vmatprep.mubr.bf16.mxu0 %v2686_v31  ;;  %v2710_v51 = vld [vmem:[%s3782_s3 + $0x10] ss:$24 sps:$4 sm:$0xff]  }
  0x9c   :  { %1173 = vmatprep.subr.bf16.mxu0 %v3013_v52  ;;  %v2713_v52 = vld [vmem:[%s3782_s3 + $0x44] ss:$24 sps:$4 sm:$0xff]  }
  0x9f   :  { %1174 = vmatpush1.bf16.msra.mxu0 %v3025_v55  ;;  %v2715_v55 = vld [vmem:[%s3782_s3 + $0x40] ss:$24 sps:$4 sm:$0xff]  }
  0xa0   :  { %1175 = vmatprep.subr.bf16.mxu0 %v3031_v56  ;;  %v2716_v56 = vld [vmem:[%s3782_s3 + $0x74] ss:$24 sps:$4 sm:$0xff]  }
  0xa2   :  { %1119 = vmatmul.mubr.bf16.gmra.mrb[16].mxu0 %v2691_v32 }
  0xa3   :  { %1176 = vmatpush1.bf16.msra.mxu0 %v3049_v61  ;;  %1128 = vmatprep.mubr.bf16.mxu0 %v2692_v34  ;;  %v2718_v61 = vld [vmem:[%s3782_s3 + $0x70] ss:$24 sps:$4 sm:$0xff]  }
  0xa4   :  { %1177 = vmatprep.subr.bf16.mxu0 %v3055_v62  ;;  %v2719_v62 = vld [vmem:[%s3782_s3 + $0xa4] ss:$24 sps:$4 sm:$0xff]  }
  0xa7   :  { %1178 = vmatpush1.bf16.msra.mxu0 %v3067_v1  ;;  %v2721_v1 = vld [vmem:[%s3782_s3 + $0xa0] ss:$24 sps:$4 sm:$0xff]  }
  0xa8   :  { %1179 = vmatprep.subr.bf16.mxu0 %v3073_v2 }
  0xaa   :  { %1129 = vmatmul.mubr.bf16.gmra.mrb[20].mxu0 %v2696_v36 }
  0xab   :  { %1180 = vmatpush1.bf16.msra.mxu0 %v3091_v7  ;;  %1138 = vmatprep.mubr.bf16.mxu0 %v2698_v39 }
  0xac   :  { %1181 = vmatprep.subr.bf16.mxu0 %v3097_v8 }
  0xaf   :  { %1182 = vmatpush1.bf16.msra.mxu0 %v3112_v12 }
  0xb0   :  { %1183 = vmatprep.subr.bf16.mxu0 %v3118_v13  ;;  %v3376_v13 = vld [vmem:[%s3783_s0] sm:$0xff]  }
  0xb1   :  { %2297 = vmatprep.mubr.bf16.mxu1 %v3376_v13 }
  0xb2   :  { %1139 = vmatmul.mubr.bf16.gmra.mrb[24].mxu0 %v2702_v41 }
  0xb3   :  { %1184 = vmatpush1.bf16.msra.mxu0 %v3136_v18  ;;  %1148 = vmatprep.mubr.bf16.mxu0 %v2704_v42 }
  0xb4   :  { %1185 = vmatprep.subr.bf16.mxu0 %v3142_v19 }
  0xb7   :  { %1186 = vmatpush1.bf16.msra.mxu0 %v3154_v22 }
  0xb8   :  { %1187 = vmatprep.subr.bf16.mxu0 %v3160_v23 }
  0xba   :  { %1149 = vmatmul.mubr.bf16.gmra.mrb[28].mxu0 %v2708_v45 }
  0xbb   :  { %1188 = vmatpush1.bf16.msra.mxu0 %v3178_v35  ;;  %1191 = vmatprep.mubr.bf16.mxu0 %v2712_v46 }
  0xbc   :  { %1189 = vmatprep.subr.bf16.mxu0 %v3184_v37 }
  0xbf   :  { %1190 = vmatpush1.bf16.msra.mxu0 %v3196_v43 }
  0xc2   :  { %1192 = vmatmul.mubr.bf16.vlgmr.msra.gmra.mrb[0].mxu0 %v2710_v51 }
  0xc3   :  { %1201 = vmatprep.mubr.bf16.mxu0 %v2713_v52 }
  0xca   :  { %1202 = vmatmul.mubr.bf16.gmra.mrb[4].mxu0 %v2715_v55 }
  0xcb   :  { %1211 = vmatprep.mubr.bf16.mxu0 %v2716_v56 }
  0xd2   :  { %1212 = vmatmul.mubr.bf16.gmra.mrb[8].mxu0 %v2718_v61 }
  0xd3   :  { %1221 = vmatprep.mubr.bf16.mxu0 %v2719_v62 }
  0xda   :  { %1222 = vmatmul.mubr.bf16.gmra.mrb[12].mxu0 %v2721_v1 }
 0x11f   :  { %v1233_v2 = vpop.f32.mrb[0].mxu1 }
 0x120   :  { %v1235_v7 = vpop.f32.mrb[1].mxu1 }
 0x121   :  { %v1237_v8 = vpop.f32.mrb[2].mxu1 }
 0x122   :  { %v1239_v12 = vpop.f32.mrb[3].mxu1 }
 0x127   :  { %v1243_v18 = vpop.f32.mrb[4].mxu1 }
 0x128   :  { %v1245_v19 = vpop.f32.mrb[5].mxu1 }
 0x129   :  { %v1247_v22 = vpop.f32.mrb[6].mxu1 }
 0x12a   :  { %v1249_v23 = vpop.f32.mrb[7].mxu1 }
 0x12f   :  { %v3379_v29 = vpop.f32.mrb[8].mxu1 }
 0x130   :  { %v3381_v30 = vpop.f32.mrb[9].mxu1 }
 0x131   :  { %v3383_v33 = vpop.f32.mrb[10].mxu1 }
 0x132   :  { %v3385_v35 = vpop.f32.mrb[11].mxu1 }
 0x137   :  { %v3387_v37 = vpop.f32.mrb[12].mxu1 }
 0x138   :  { %v3389_v38 = vpop.f32.mrb[13].mxu1 }
 0x139   :  { %v3391_v40 = vpop.f32.mrb[14].mxu1 }
 0x13a   :  { %v3393_v43 = vpop.f32.mrb[15].mxu1 }
 0x175   :  { %v1120_v3 = vpop.f32.mrb[16].mxu0 }
 0x176   :  { %v2436_v6 = vadd.f32 %v1233_v2, %v1120_v3  ;;  %v1122_v9 = vpop.f32.mrb[17].mxu0  ;;  %v3496_v3 = vld [vmem:[%s3783_s0 + $0x10] sm:$0xff]  }
 0x177   :  { %v3439_v10 = vadd.f32 %v1235_v7, %v1122_v9  ;;  %v1124_v11 = vpop.f32.mrb[18].mxu0  ;;  %v2738_v9 = vld [vmem:[%s3785_s6 + $0x24] ss:$8 sps:$4 sm:$0xff]  }
 0x178   :  { %v2438_v14 = vadd.f32 %v1237_v8, %v1124_v11  ;;  %v1126_v15 = vpop.f32.mrb[19].mxu0  ;;  %v3515_v11 = vld [vmem:[%s3783_s0 + $0x18] sm:$0xff]  }
 0x179   :  { %v3441_v16 = vadd.f32 %v1239_v12, %v1126_v15  ;;  %v2736_v15 = vld [vmem:[%s3785_s6 + $0x20] ss:$8 sps:$4 sm:$0xff]  }
 0x17a   :  { %v1276_v21 = vpack.c.bf16 %v2438_v14, %v2436_v6  ;;  %v2733_v6 = vld [vmem:[%s3785_s6 + $0x10] ss:$8 sps:$4 sm:$0xff]   ;;  %v3520_v14 = vld [vmem:[%s3783_s0 + $0x20] sm:$0xff]  }
 0x17d   :  { %v1130_v26 = vpop.f32.mrb[20].mxu0 }
 0x17e   :  { %v2440_v24 = vadd.f32 %v1243_v18, %v1130_v26  ;;  %v1132_v25 = vpop.f32.mrb[21].mxu0  ;;  %v3539_v26 = vld [vmem:[%s3783_s0 + $0x28] sm:$0xff]  }
 0x17f   :  { %v3449_v27 = vadd.f32 %v1245_v19, %v1132_v25  ;;  %v1134_v28 = vpop.f32.mrb[22].mxu0  ;;  %v2742_v25 = vld [vmem:[%s3785_s6 + $0x40] ss:$8 sps:$4 sm:$0xff]  }
 0x180   :  { %v2442_v31 = vadd.f32 %v1247_v22, %v1134_v28  ;;  %v1136_v32 = vpop.f32.mrb[23].mxu0  ;;  %v3554_v28 = vld [vmem:[%s3783_s0 + $0x38] sm:$0xff]  }
 0x181   :  { %v3451_v34 = vadd.f32 %v1249_v23, %v1136_v32  ;;  %v2745_v32 = vld [vmem:[%s3785_s6 + $0x50] ss:$8 sps:$4 sm:$0xff]  }
 0x182   :  { %v1277_v36 = vpack.c.bf16 %v2442_v31, %v2440_v24  ;;  %v3544_v24 = vld [vmem:[%s3783_s0 + $0x30] sm:$0xff]  }
 0x183   :  { %v2747_v31 = vld [vmem:[%s3785_s6 + $0x54] ss:$8 sps:$4 sm:$0xff]  }
 0x185   :  { %v1140_v39 = vpop.f32.mrb[24].mxu0 }
 0x186   :  { %v2444_v41 = vadd.f32 %v3379_v29, %v1140_v39  ;;  %v1142_v42 = vpop.f32.mrb[25].mxu0  ;;  %v2748_v39 = vld [vmem:[%s3785_s6 + $0x60] ss:$8 sps:$4 sm:$0xff]  }
 0x187   :  { %v3455_v45 = vadd.f32 %v3381_v30, %v1142_v42  ;;  %v1144_v46 = vpop.f32.mrb[26].mxu0  ;;  %v2751_v42 = vld [vmem:[%s3785_s6 + $0x70] ss:$8 sps:$4 sm:$0xff]  }
 0x188   :  { %v2446_v51 = vadd.f32 %v3383_v33, %v1144_v46  ;;  %v1146_v52 = vpop.f32.mrb[27].mxu0  ;;  %v3576_v46 = vpop.permute.xlu0 %1427 }
 0x189   :  { %v3459_v55 = vadd.f32 %v3385_v35, %v1146_v52 }
 0x18a   :  { %v1278_v56 = vpack.c.bf16 %v2446_v51, %v2444_v41  ;;  %v2753_v41 = vld [vmem:[%s3785_s6 + $0x74] ss:$8 sps:$4 sm:$0xff]   ;;  %v3578_v51 = vpop.permute.xlu1 %1437 }
 0x18c   :  { %v3580_v52 = vpop.permute.xlu0 %1432 }
 0x18d   :  { %v1150_v61 = vpop.f32.mrb[28].mxu0 }
 0x18e   :  { %v2448_v62 = vadd.f32 %v3387_v37, %v1150_v61  ;;  %v1152_v1 = vpop.f32.mrb[29].mxu0 }
 0x18f   :  { %v3463_v2 = vadd.f32 %v3389_v38, %v1152_v1  ;;  %v1154_v7 = vpop.f32.mrb[30].mxu0 }
 0x190   :  { %v2450_v8 = vadd.f32 %v3391_v40, %v1154_v7  ;;  %v1156_v12 = vpop.f32.mrb[31].mxu0  ;;  %v3584_v61 = vpop.permute.xlu0 %1447 }
 0x191   :  { %v3467_v18 = vadd.f32 %v3393_v43, %v1156_v12 }
 0x192   :  { %v1279_v19 = vpack.c.bf16 %v2450_v8, %v2448_v62 }
 0x194   :  { %v3588_v1 = vpop.permute.xlu0 %1457 }
 0x195   :  { %v1193_v22 = vpop.f32.mrb[0].mxu0 }
 0x196   :  { %v3469_v23 = vpop.f32.mrb[1].mxu0 }
 0x197   :  { %v1197_v29 = vpop.f32.mrb[2].mxu0 }
 0x198   :  { %v1272_v30 = vpack.c.bf16 %v1197_v29, %v1193_v22  ;;  %v3471_v33 = vpop.f32.mrb[3].mxu0  ;;  %v3596_v22 = vld [vmem:[%s3786_s5] ss:$0 sm:$0xff] }
 0x19a   :  { %2281 = vmatprep.subr.bf16.mxu1 %v1272_v30 }
 0x19b   :  { %2282 = vmatpush3.bf16.msra.mxu1 %v1272_v30 }
 0x19d   :  { %v1203_v35 = vpop.f32.mrb[4].mxu0 }
 0x19e   :  { %v3473_v37 = vpop.f32.mrb[5].mxu0 }
 0x19f   :  { %v1207_v38 = vpop.f32.mrb[6].mxu0 }
 0x1a0   :  { %v1273_v47 = vpack.c.bf16 %v1207_v38, %v1203_v35  ;;  %v3475_v40 = vpop.f32.mrb[7].mxu0 }
 0x1a2   :  { %2283 = vmatprep.subr.bf16.mxu1 %v1273_v47 }
 0x1a3   :  { %2284 = vmatpush3.bf16.msra.mxu1 %v1273_v47 }
 0x1a5   :  { %v1213_v43 = vpop.f32.mrb[8].mxu0 }
 0x1a6   :  { %v3477_v48 = vpop.f32.mrb[9].mxu0 }
 0x1a7   :  { %v1217_v49 = vpop.f32.mrb[10].mxu0 }
 0x1a8   :  { %v1274_v50 = vpack.c.bf16 %v1217_v49, %v1213_v43  ;;  %v3479_v53 = vpop.f32.mrb[11].mxu0 }
 0x1aa   :  { %2285 = vmatprep.subr.bf16.mxu1 %v1274_v50 }
 0x1ab   :  { %2286 = vmatpush3.bf16.msra.mxu1 %v1274_v50 }
 0x1ad   :  { %v1223_v54 = vpop.f32.mrb[12].mxu0 }
 0x1ae   :  { %v3481_v57 = vpop.f32.mrb[13].mxu0 }
 0x1af   :  { %v1227_v58 = vpop.f32.mrb[14].mxu0 }
 0x1b0   :  { %v1275_v59 = vpack.c.bf16 %v1227_v58, %v1223_v54  ;;  %v3483_v60 = vpop.f32.mrb[15].mxu0  ;;  %v3605_v58 = vpop.permute.xlu0 %1467 }
 0x1b2   :  { %2287 = vmatprep.subr.bf16.mxu1 %v1275_v59 }
 0x1b3   :  { %2288 = vmatpush3.bf16.msra.mxu1 %v1275_v59 }
 0x1b4   :  { %2289 = vmatprep.subr.bf16.mxu1 %v1276_v21 }
 0x1b7   :  { %2290 = vmatpush3.bf16.msra.mxu1 %v1276_v21  ;;  %v2744_v21 = vld [vmem:[%s3785_s6 + $0x44] ss:$8 sps:$4 sm:$0xff]  }
 0x1b8   :  { %2291 = vmatprep.subr.bf16.mxu1 %v1277_v36 }
 0x1bb   :  { %2292 = vmatpush3.bf16.msra.mxu1 %v1277_v36  ;;  %v2750_v36 = vld [vmem:[%s3785_s6 + $0x64] ss:$8 sps:$4 sm:$0xff]  }
 0x1bc   :  { %2293 = vmatprep.subr.bf16.mxu1 %v1278_v56 }
 0x1bf   :  { %2294 = vmatpush3.bf16.msra.mxu1 %v1278_v56  ;;  %v3582_v56 = vpop.permute.xlu1 %1442 }
 0x1c0   :  { %2295 = vmatprep.subr.bf16.mxu1 %v1279_v19 }
 0x1c3   :  { %2296 = vmatpush3.bf16.msra.mxu1 %v1279_v19  ;;  %v3586_v62 = vpop.permute.xlu1 %1452 }
 0x1c4   :  { %1680 = vmatprep.subr.bf16.mxu1 %v2732_v63 }
 0x1c6   :  { %2298 = vmatmul.mubr.bf16.vlgmr.msra.gmra.mrb[16].mxu1 %v3491_v0 }
 0x1c7   :  { %2301 = vmatprep.mubr.bf16.mxu1 %v3496_v3  ;;  %1681 = vmatpush1.bf16.msra.mxu1 %v2730_v4  ;;  %v3591_v19 = vpop.permute.xlu1 %1462 }
 0x1c8   :  { %1682 = vmatprep.subr.bf16.mxu1 %v2735_v5 }
 0x1cb   :  { %1683 = vmatpush1.bf16.msra.mxu1 %v2733_v6 }
 0x1cc   :  { %1684 = vmatprep.subr.bf16.mxu1 %v2738_v9 }
 0x1ce   :  { %2302 = vmatmul.mubr.bf16.gmra.mrb[20].mxu1 %v3515_v11 }
 0x1cf   :  { %2305 = vmatprep.mubr.bf16.mxu1 %v3520_v14  ;;  %1685 = vmatpush1.bf16.msra.mxu1 %v2736_v15 }
 0x1d0   :  { %1686 = vmatprep.subr.bf16.mxu1 %v2741_v17 }
 0x1d3   :  { %1687 = vmatpush1.bf16.msra.mxu1 %v2739_v20 }
 0x1d4   :  { %1688 = vmatprep.subr.bf16.mxu1 %v2744_v21 }
 0x1d6   :  { %2306 = vmatmul.mubr.bf16.gmra.mrb[24].mxu1 %v3539_v26 }
 0x1d7   :  { %2309 = vmatprep.mubr.bf16.mxu1 %v3544_v24  ;;  %1689 = vmatpush1.bf16.msra.mxu1 %v2742_v25 }
 0x1d8   :  { %1690 = vmatprep.subr.bf16.mxu1 %v2747_v31 }
 0x1db   :  { %1691 = vmatpush1.bf16.msra.mxu1 %v2745_v32 }
 0x1dc   :  { %1692 = vmatprep.subr.bf16.mxu1 %v2750_v36 }
 0x1de   :  { %2310 = vmatmul.mubr.bf16.gmra.mrb[28].mxu1 %v3554_v28 }
 0x1df   :  { %1712 = vmatprep.mubr.bf16.mxu1 %v2754_v44  ;;  %1693 = vmatpush1.bf16.msra.mxu1 %v2748_v39  ;;  %v3617_v39 = vpop.permute.xlu0 %1477 }
 0x1e0   :  { %1694 = vmatprep.subr.bf16.mxu1 %v2753_v41 }
 0x1e3   :  { %1695 = vmatpush1.bf16.msra.mxu1 %v2751_v42 }
 0x299   :  { %v2299_v7 = vpop.f32.mrb[16].mxu1 }
 0x29a   :  { %v1507_v8 = vmul.f32 %v2299_v7, %v3578_v51  ;;  %v1362_v12 = vpop.f32.mrb[17].mxu1 }
 0x29b   :  { %v1505_v29 = vmul.f32 %v3576_v46, %v1362_v12  ;;  %v2300_v30 = vpop.f32.mrb[18].mxu1 }
 0x29c   :  { %v1523_v35 = vadd.f32 %v1507_v8, %v3473_v37  ;;  %v1508_v38 = vmul.f32 %v2300_v30, %v3582_v56  ;;  %v1365_v47 = vpop.f32.mrb[19].mxu1  ;;  %v3610_v37 = vpop.permute.xlu1 %1472 }
 0x29d   :  { %v1521_v43 = vadd.f32 %v1505_v29, %v3469_v23  ;;  %v1506_v49 = vmul.f32 %v3580_v52, %v1365_v47 }
 0x29e   :  { %v1546_v50 = vadd.f32 %v3596_v22, %v1523_v35  ;;  %v1524_v54 = vadd.f32 %v1508_v38, %v3475_v40 }
 0x29f   :  { %v1544_v59 = vadd.f32 %v3596_v22, %v1521_v43  ;;  %v1522_v63 = vadd.f32 %v1506_v49, %v3471_v33 }
 0x2a0   :  { %v1547_v4 = vadd.f32 %v3596_v22, %v1524_v54  ;;  %v1562_v23 = vmax.f32 %v1546_v50, 0.0  ;;  %v3623_v29 = vpop.permute.xlu1 %1482 }
 0x2a1   :  { %v1545_v5 = vadd.f32 %v3596_v22, %v1522_v63  ;;  %v2303_v6 = vpop.f32.mrb[20].mxu1  ;;  %v1560_v20 = vmax.f32 %v1544_v59, 0.0 }
 0x2a2   :  { %v1563_v9 = vmax.f32 %v1547_v4, 0.0  ;;  %v1511_v15 = vmul.f32 %v2303_v6, %v3588_v1  ;;  %v1378_v17 = vpop.f32.mrb[21].mxu1 }
 0x2a3   :  { %v1561_v40 = vmax.f32 %v1545_v5, 0.0  ;;  %v1509_v21 = vmul.f32 %v3584_v61, %v1378_v17  ;;  %v2304_v25 = vpop.f32.mrb[22].mxu1 }
 0x2a4   :  { %v1527_v31 = vadd.f32 %v1511_v15, %v3481_v57  ;;  %v1512_v33 = vmul.f32 %v2304_v25, %v3591_v19  ;;  %v1381_v32 = vpop.f32.mrb[23].mxu1  ;;  %v1577_v36 = vpack.c.bf16 %v1563_v9, %v1562_v23  ;;  %v3636_v9 = vpop.permute.xlu1 %1492 }
 0x2a5   :  { %v1576_v41 = vpack.c.bf16 %v1561_v40, %v1560_v20  ;;  %v1525_v42 = vadd.f32 %v1509_v21, %v3477_v48  ;;  %v1510_v7 = vmul.f32 %v3586_v62, %v1381_v32 }
 0x2a6   :  { %v1550_v8 = vadd.f32 %v3596_v22, %v1527_v31  ;;  %v1528_v12 = vadd.f32 %v1512_v33, %v3483_v60  ;;  %v3631_v60 = vpop.permute.xlu0 %1487 }
 0x2a7   :  { %v1548_v30 = vadd.f32 %v3596_v22, %v1525_v42  ;;  %v1526_v57 = vadd.f32 %v1510_v7, %v3479_v53  ;;  %1713 = vmatmul.mubr.bf16.vlgmr.msra.gmra.mrb[32].mxu1 %v1576_v41 }
 0x2a8   :  { %v1551_v35 = vadd.f32 %v3596_v22, %v1528_v12  ;;  %1722 = vmatprep.mubr.bf16.mxu1 %v2754_v44  ;;  %v1566_v47 = vmax.f32 %v1550_v8, 0.0 }
 0x2a9   :  { %v1549_v38 = vadd.f32 %v3596_v22, %v1526_v57  ;;  %v2307_v48 = vpop.f32.mrb[24].mxu1  ;;  %v1564_v54 = vmax.f32 %v1548_v30, 0.0 }
 0x2aa   :  { %v1567_v43 = vmax.f32 %v1551_v35, 0.0  ;;  %v1515_v49 = vmul.f32 %v2307_v48, %v3617_v39  ;;  %v1394_v50 = vpop.f32.mrb[25].mxu1  ;;  %v3646_v33 = vpop.permute.xlu0 %1497 }
 0x2ab   :  { %v1565_v59 = vmax.f32 %v1549_v38, 0.0  ;;  %v1513_v63 = vmul.f32 %v3605_v58, %v1394_v50  ;;  %v2308_v53 = vpop.f32.mrb[26].mxu1 }
 0x2ac   :  { %v1531_v4 = vadd.f32 %v3449_v27, %v1515_v49  ;;  %v1516_v5 = vmul.f32 %v2308_v53, %v3623_v29  ;;  %v1397_v6 = vpop.f32.mrb[27].mxu1  ;;  %v1579_v23 = vpack.c.bf16 %v1567_v43, %v1566_v47 }
 0x2ad   :  { %v1529_v15 = vadd.f32 %v3439_v10, %v1513_v63  ;;  %v1514_v17 = vmul.f32 %v3610_v37, %v1397_v6  ;;  %v1578_v20 = vpack.c.bf16 %v1565_v59, %v1564_v54 }
 0x2ae   :  { %v1554_v40 = vadd.f32 %v3596_v22, %v1531_v4  ;;  %v1532_v21 = vadd.f32 %v3451_v34, %v1516_v5  ;;  %v3650_v34 = vpop.permute.xlu1 %1502 }
 0x2af   :  { %v1552_v25 = vadd.f32 %v3596_v22, %v1529_v15  ;;  %v1530_v31 = vadd.f32 %v3441_v16, %v1514_v17  ;;  %1723 = vmatmul.mubr.bf16.gmra.mrb[36].mxu1 %v1577_v36 }
 0x2b0   :  { %v1555_v27 = vadd.f32 %v3596_v22, %v1532_v21  ;;  %1732 = vmatprep.mubr.bf16.mxu1 %v2754_v44  ;;  %v1570_v41 = vmax.f32 %v1554_v40, 0.0 }
 0x2b1   :  { %v1553_v10 = vadd.f32 %v3596_v22, %v1530_v31  ;;  %v2311_v32 = vpop.f32.mrb[28].mxu1  ;;  %v1568_v12 = vmax.f32 %v1552_v25, 0.0 }
 0x2b2   :  { %v1571_v42 = vmax.f32 %v1555_v27, 0.0  ;;  %v1519_v7 = vmul.f32 %v2311_v32, %v3646_v33  ;;  %v1410_v8 = vpop.f32.mrb[29].mxu1 }
 0x2b3   :  { %v1569_v30 = vmax.f32 %v1553_v10, 0.0  ;;  %v1517_v16 = vmul.f32 %v3631_v60, %v1410_v8  ;;  %v2312_v36 = vpop.f32.mrb[30].mxu1 }
 0x2b4   :  { %v1535_v57 = vadd.f32 %v3463_v2, %v1519_v7  ;;  %v1520_v35 = vmul.f32 %v2312_v36, %v3650_v34  ;;  %v1413_v38 = vpop.f32.mrb[31].mxu1  ;;  %v1581_v48 = vpack.c.bf16 %v1571_v42, %v1570_v41 }
 0x2b5   :  { %v1533_v47 = vadd.f32 %v3455_v45, %v1517_v16  ;;  %v1518_v43 = vmul.f32 %v3636_v9, %v1413_v38  ;;  %v1580_v49 = vpack.c.bf16 %v1569_v30, %v1568_v12 }
 0x2b6   :  { %v1558_v50 = vadd.f32 %v3596_v22, %v1535_v57  ;;  %v1536_v54 = vadd.f32 %v3467_v18, %v1520_v35 }
 0x2b7   :  { %v1556_v59 = vadd.f32 %v3596_v22, %v1533_v47  ;;  %v1534_v63 = vadd.f32 %v3459_v55, %v1518_v43  ;;  %1733 = vmatmul.mubr.bf16.gmra.mrb[40].mxu1 %v1578_v20 }
 0x2b8   :  { %v1559_v2 = vadd.f32 %v3596_v22, %v1536_v54  ;;  %1742 = vmatprep.mubr.bf16.mxu1 %v2754_v44  ;;  %v1574_v4 = vmax.f32 %v1558_v50, 0.0 }
 0x2b9   :  { %v1557_v53 = vadd.f32 %v3596_v22, %v1534_v63  ;;  %v1572_v5 = vmax.f32 %v1556_v59, 0.0 }
 0x2ba   :  { %v1575_v45 = vmax.f32 %v1559_v2, 0.0 }
 0x2bb   :  { %v1573_v6 = vmax.f32 %v1557_v53, 0.0 }
 0x2bc   :  { %v1583_v15 = vpack.c.bf16 %v1575_v45, %v1574_v4 }
 0x2bd   :  { %v1582_v17 = vpack.c.bf16 %v1573_v6, %v1572_v5 }
 0x2bf   :  { %1743 = vmatmul.mubr.bf16.gmra.mrb[44].mxu1 %v1579_v23 }
 0x2c0   :  { %1752 = vmatprep.mubr.bf16.mxu1 %v2754_v44 }
 0x2c7   :  { %1753 = vmatmul.mubr.bf16.gmra.mrb[48].mxu1 %v1580_v49 }
 0x2c8   :  { %1762 = vmatprep.mubr.bf16.mxu1 %v2754_v44 }
 0x2cf   :  { %1763 = vmatmul.mubr.bf16.gmra.mrb[52].mxu1 %v1581_v48 }
 0x2d0   :  { %1772 = vmatprep.mubr.bf16.mxu1 %v2754_v44 }
 0x2d7   :  { %1773 = vmatmul.mubr.bf16.gmra.mrb[56].mxu1 %v1582_v17  ;;  %v2755_v17 = vmov 0.0|0.0  }
 0x2d8   :  { %1782 = vmatprep.mubr.bf16.mxu1 %v2754_v44 }
 0x2df   :  { %1783 = vmatmul.mubr.bf16.gmra.mrb[60].mxu1 %v1583_v15 }
 0x2e0   :  { %2329 = vmatprep.mubr.bf16.mxu1 %v3376_v13 }
 0x37a   :  { %v1714_v55 = vpop.f32.mrb[32].mxu1 }
 0x37b   :  { %v3669_v18 = vpop.f32.mrb[33].mxu1 }
 0x37c   :  { %v1718_v22 = vpop.f32.mrb[34].mxu1 }
 0x37d   :  { %v1793_v20 = vpack.c.bf16 %v1718_v22, %v1714_v55  ;;  %v3671_v23 = vpop.f32.mrb[35].mxu1  ;;  %v2757_v55 = vmov 0.0  }
 0x37f   :  { %2313 = vmatprep.subr.bf16.mxu1 %v1793_v20 }
 0x380   :  { %2314 = vmatpush3.bf16.msra.mxu1 %v1793_v20 }
 0x382   :  { %v1724_v40 = vpop.f32.mrb[36].mxu1 }
 0x383   :  { %v3673_v21 = vpop.f32.mrb[37].mxu1 }
 0x384   :  { %v1728_v25 = vpop.f32.mrb[38].mxu1 }
 0x385   :  { %v1794_v31 = vpack.c.bf16 %v1728_v25, %v1724_v40  ;;  %v3675_v27 = vpop.f32.mrb[39].mxu1 }
 0x387   :  { %2315 = vmatprep.subr.bf16.mxu1 %v1794_v31 }
 0x388   :  { %2316 = vmatpush3.bf16.msra.mxu1 %v1794_v31 }
 0x38a   :  { %v1734_v44 = vpop.f32.mrb[40].mxu1 }
 0x38b   :  { %v3677_v13 = vpop.f32.mrb[41].mxu1 }
 0x38c   :  { %v1738_v10 = vpop.f32.mrb[42].mxu1 }
 0x38d   :  { %v1795_v32 = vpack.c.bf16 %v1738_v10, %v1734_v44  ;;  %v3679_v41 = vpop.f32.mrb[43].mxu1 }
 0x38f   :  { %2317 = vmatprep.subr.bf16.mxu1 %v1795_v32 }
 0x390   :  { %2318 = vmatpush3.bf16.msra.mxu1 %v1795_v32 }
 0x392   :  { %v1744_v42 = vpop.f32.mrb[44].mxu1 }
 0x393   :  { %v3681_v7 = vpop.f32.mrb[45].mxu1 }
 0x394   :  { %v1748_v8 = vpop.f32.mrb[46].mxu1 }
 0x395   :  { %v1796_v12 = vpack.c.bf16 %v1748_v8, %v1744_v42  ;;  %v3683_v30 = vpop.f32.mrb[47].mxu1 }
 0x397   :  { %2319 = vmatprep.subr.bf16.mxu1 %v1796_v12 }
 0x398   :  { %2320 = vmatpush3.bf16.msra.mxu1 %v1796_v12 }
 0x39a   :  { %v1754_v16 = vpop.f32.mrb[48].mxu1 }
 0x39b   :  { %v3685_v36 = vpop.f32.mrb[49].mxu1 }
 0x39c   :  { %v1758_v57 = vpop.f32.mrb[50].mxu1 }
 0x39d   :  { %v1797_v35 = vpack.c.bf16 %v1758_v57, %v1754_v16  ;;  %v3687_v38 = vpop.f32.mrb[51].mxu1 }
 0x39f   :  { %2321 = vmatprep.subr.bf16.mxu1 %v1797_v35 }
 0x3a0   :  { %2322 = vmatpush3.bf16.msra.mxu1 %v1797_v35 }
 0x3a2   :  { %v1764_v48 = vpop.f32.mrb[52].mxu1 }
 0x3a3   :  { %v3689_v47 = vpop.f32.mrb[53].mxu1 }
 0x3a4   :  { %v1768_v43 = vpop.f32.mrb[54].mxu1 }
 0x3a5   :  { %v1798_v49 = vpack.c.bf16 %v1768_v43, %v1764_v48  ;;  %v3691_v50 = vpop.f32.mrb[55].mxu1 }
 0x3a7   :  { %2323 = vmatprep.subr.bf16.mxu1 %v1798_v49 }
 0x3a8   :  { %2324 = vmatpush3.bf16.msra.mxu1 %v1798_v49 }
 0x3aa   :  { %v1774_v54 = vpop.f32.mrb[56].mxu1 }
 0x3ab   :  { %v3693_v59 = vpop.f32.mrb[57].mxu1 }
 0x3ac   :  { %v1778_v63 = vpop.f32.mrb[58].mxu1 }
 0x3ad   :  { %v1799_v2 = vpack.c.bf16 %v1778_v63, %v1774_v54  ;;  %v3695_v53 = vpop.f32.mrb[59].mxu1 }
 0x3af   :  { %2325 = vmatprep.subr.bf16.mxu1 %v1799_v2 }
 0x3b0   :  { %2326 = vmatpush3.bf16.msra.mxu1 %v1799_v2 }
 0x3b2   :  { %v1784_v4 = vpop.f32.mrb[60].mxu1 }
 0x3b3   :  { %v3697_v45 = vpop.f32.mrb[61].mxu1 }
 0x3b4   :  { %v1788_v5 = vpop.f32.mrb[62].mxu1 }
 0x3b5   :  { %v1800_v6 = vpack.c.bf16 %v1788_v5, %v1784_v4  ;;  %v3699_v15 = vpop.f32.mrb[63].mxu1 }
 0x3b7   :  { %2327 = vmatprep.subr.bf16.mxu1 %v1800_v6 }
 0x3b8   :  { %2328 = vmatpush3.bf16.msra.mxu1 %v1800_v6 }
 0x3b9   :  { %2380 = vmatprep.subr.bf16.mxu1 %v2755_v17 }
 0x3bb   :  { %2330 = vmatmul.mubr.bf16.vlgmr.msra.gmra.mrb[64].mxu1 %v3491_v0 }
 0x3bc   :  { %2333 = vmatprep.mubr.bf16.mxu1 %v3496_v3 }
 0x3c3   :  { %2334 = vmatmul.mubr.bf16.gmra.mrb[68].mxu1 %v3515_v11  ;;  %v3713_v11 = vld [vmem:[%s3787_s7] ss:$0 sm:$0xff] }
 0x3c4   :  { %2337 = vmatprep.mubr.bf16.mxu1 %v3520_v14 }
 0x3cb   :  { %2338 = vmatmul.mubr.bf16.gmra.mrb[72].mxu1 %v3539_v26 }
 0x3cc   :  { %2341 = vmatprep.mubr.bf16.mxu1 %v3544_v24 }
 0x3d3   :  { %2342 = vmatmul.mubr.bf16.gmra.mrb[76].mxu1 %v3554_v28 }
 0x3d4   :  { %2377 = vmatprep.mubr.msk.f32.mxu1 %vm2756_vm0, %v2757_v55 }
 0x48e   :  { %v2331_v22 = vpop.f32.mrb[64].mxu1 }
 0x48f   :  { %v1900_v0 = vmul.f32 %v2331_v22, %v3578_v51  ;;  %v1835_v3 = vpop.f32.mrb[65].mxu1 }
 0x490   :  { %v1898_v14 = vmul.f32 %v1835_v3, %v3576_v46  ;;  %v2332_v26 = vpop.f32.mrb[66].mxu1 }
 0x491   :  { %v1916_v24 = vadd.f32 %v1900_v0, %v3673_v21  ;;  %v1901_v28 = vmul.f32 %v2332_v26, %v3582_v56  ;;  %v1838_v20 = vpop.f32.mrb[67].mxu1 }
 0x492   :  { %v1914_v40 = vadd.f32 %v1898_v14, %v3669_v18  ;;  %v1899_v25 = vmul.f32 %v1838_v20, %v3580_v52 }
 0x493   :  { %v1939_v51 = vadd.f32 %v3713_v11, %v1916_v24  ;;  %v1917_v31 = vadd.f32 %v1901_v28, %v3675_v27 }
 0x494   :  { %v1937_v44 = vadd.f32 %v3713_v11, %v1914_v40  ;;  %v1915_v10 = vadd.f32 %v1899_v25, %v3671_v23 }
 0x495   :  { %v1940_v46 = vadd.f32 %v3713_v11, %v1917_v31  ;;  %v1955_v42 = vmax.f32 %v1939_v51, 0.0 }
 0x496   :  { %v1938_v32 = vadd.f32 %v3713_v11, %v1915_v10  ;;  %v2335_v21 = vpop.f32.mrb[68].mxu1  ;;  %v1953_v12 = vmax.f32 %v1937_v44, 0.0 }
 0x497   :  { %v1956_v56 = vmax.f32 %v1940_v46, 0.0  ;;  %v1904_v8 = vmul.f32 %v2335_v21, %v3588_v1  ;;  %v1851_v18 = vpop.f32.mrb[69].mxu1 }
 0x498   :  { %v1954_v52 = vmax.f32 %v1938_v32, 0.0  ;;  %v1902_v16 = vmul.f32 %v1851_v18, %v3584_v61  ;;  %v2336_v57 = vpop.f32.mrb[70].mxu1 }
 0x499   :  { %v2384_v27 = vpack.c.bf16 %v1956_v56, %v1955_v42  ;;  %v1920_v35 = vadd.f32 %v1904_v8, %v3681_v7  ;;  %v1905_v23 = vmul.f32 %v2336_v57, %v3591_v19  ;;  %v1854_v48 = vpop.f32.mrb[71].mxu1 }
 0x49a   :  { %v2381_v43 = vpack.c.bf16 %v1954_v52, %v1953_v12  ;;  %v1918_v49 = vadd.f32 %v1902_v16, %v3677_v13  ;;  %v1903_v54 = vmul.f32 %v1854_v48, %v3586_v62 }
 0x49b   :  { %v1943_v63 = vadd.f32 %v3713_v11, %v1920_v35  ;;  %v1921_v1 = vadd.f32 %v1905_v23, %v3683_v30 }
 0x49c   :  { %v1941_v2 = vadd.f32 %v3713_v11, %v1918_v49  ;;  %v1919_v61 = vadd.f32 %v1903_v54, %v3679_v41  ;;  %2382 = vmatpush3.bf16.msra.mxu1 %v2381_v43 }
 0x49d   :  { %v1944_v4 = vadd.f32 %v3713_v11, %v1921_v1  ;;  %2383 = vmatprep.subr.bf16.mxu1 %v2755_v17  ;;  %v1959_v5 = vmax.f32 %v1943_v63, 0.0 }
 0x49e   :  { %v1942_v19 = vadd.f32 %v3713_v11, %v1919_v61  ;;  %v2339_v7 = vpop.f32.mrb[72].mxu1  ;;  %v1957_v55 = vmax.f32 %v1941_v2, 0.0 }
 0x49f   :  { %v1960_v13 = vmax.f32 %v1944_v4, 0.0  ;;  %v1908_v62 = vmul.f32 %v2339_v7, %v3617_v39  ;;  %v1867_v6 = vpop.f32.mrb[73].mxu1 }
 0x4a0   :  { %v1958_v22 = vmax.f32 %v1942_v19, 0.0  ;;  %v1906_v30 = vmul.f32 %v1867_v6, %v3605_v58  ;;  %v2340_v0 = vpop.f32.mrb[74].mxu1  ;;  %2385 = vmatpush3.bf16.msra.mxu1 %v2384_v27 }
 0x4a1   :  { %v2390_v41 = vpack.c.bf16 %v1960_v13, %v1959_v5  ;;  %v1924_v3 = vadd.f32 %v1908_v62, %v3689_v47  ;;  %v1909_v14 = vmul.f32 %v2340_v0, %v3623_v29  ;;  %v1870_v26 = vpop.f32.mrb[75].mxu1  ;;  %2386 = vmatprep.subr.bf16.mxu1 %v2755_v17 }
 0x4a2   :  { %v2387_v24 = vpack.c.bf16 %v1958_v22, %v1957_v55  ;;  %v1922_v28 = vadd.f32 %v1906_v30, %v3685_v36  ;;  %v1907_v39 = vmul.f32 %v1870_v26, %v3610_v37 }
 0x4a3   :  { %v1947_v20 = vadd.f32 %v3713_v11, %v1924_v3  ;;  %v1925_v40 = vadd.f32 %v1909_v14, %v3691_v50 }
 0x4a4   :  { %v1945_v58 = vadd.f32 %v3713_v11, %v1922_v28  ;;  %v1923_v25 = vadd.f32 %v1907_v39, %v3687_v38  ;;  %2388 = vmatpush3.bf16.msra.mxu1 %v2387_v24 }
 0x4a5   :  { %v1948_v47 = vadd.f32 %v3713_v11, %v1925_v40  ;;  %2389 = vmatprep.subr.bf16.mxu1 %v2755_v17  ;;  %v1963_v31 = vmax.f32 %v1947_v20, 0.0 }
 0x4a6   :  { %v1946_v29 = vadd.f32 %v3713_v11, %v1923_v25  ;;  %v2343_v51 = vpop.f32.mrb[76].mxu1  ;;  %v1961_v10 = vmax.f32 %v1945_v58, 0.0 }
 0x4a7   :  { %v1964_v36 = vmax.f32 %v1948_v47, 0.0  ;;  %v1912_v37 = vmul.f32 %v2343_v51, %v3646_v33  ;;  %v1883_v44 = vpop.f32.mrb[77].mxu1 }
 0x4a8   :  { %v1962_v46 = vmax.f32 %v1946_v29, 0.0  ;;  %v1910_v50 = vmul.f32 %v1883_v44, %v3631_v60  ;;  %v2344_v32 = vpop.f32.mrb[78].mxu1  ;;  %2391 = vmatpush3.bf16.msra.mxu1 %v2390_v41 }
 0x4a9   :  { %v2396_v38 = vpack.c.bf16 %v1964_v36, %v1963_v31  ;;  %v1928_v21 = vadd.f32 %v1912_v37, %v3697_v45  ;;  %v1913_v42 = vmul.f32 %v2344_v32, %v3650_v34  ;;  %v1886_v56 = vpop.f32.mrb[79].mxu1  ;;  %2392 = vmatprep.subr.bf16.mxu1 %v2755_v17 }
 0x4aa   :  { %v2393_v8 = vpack.c.bf16 %v1962_v46, %v1961_v10  ;;  %v1926_v18 = vadd.f32 %v1910_v50, %v3693_v59  ;;  %v1911_v33 = vmul.f32 %v1886_v56, %v3636_v9 }
 0x4ab   :  { %v1951_v12 = vadd.f32 %v3713_v11, %v1928_v21  ;;  %v1929_v52 = vadd.f32 %v1913_v42, %v3699_v15 }
 0x4ac   :  { %v1949_v60 = vadd.f32 %v3713_v11, %v1926_v18  ;;  %v1927_v16 = vadd.f32 %v1911_v33, %v3695_v53  ;;  %2394 = vmatpush3.bf16.msra.mxu1 %v2393_v8  ;;  %v1969_v53 = vld [vmem:[%s3788_s2] sm:$0x3] }
 0x4ad   :  { %v1952_v45 = vadd.f32 %v3713_v11, %v1929_v52  ;;  %2395 = vmatprep.subr.bf16.mxu1 %v2755_v17  ;;  %v1967_v57 = vmax.f32 %v1951_v12, 0.0 }
 0x4ae   :  { %v1950_v34 = vadd.f32 %v3713_v11, %v1927_v16  ;;  %v1965_v59 = vmax.f32 %v1949_v60, 0.0  ;;  %v2231_v11 = vld [vmem:[%s3789_s8] ss:$0 sm:$0xff] }
 0x4af   :  { %v1968_v27 = vmax.f32 %v1952_v45, 0.0 }
 0x4b0   :  { %v1966_v35 = vmax.f32 %v1950_v34, 0.0  ;;  %2397 = vmatpush3.bf16.msra.mxu1 %v2396_v38 }
 0x4b1   :  { %v2402_v9 = vpack.c.bf16 %v1968_v27, %v1967_v57  ;;  %2398 = vmatprep.subr.bf16.mxu1 %v2755_v17 }
 0x4b2   :  { %v2399_v15 = vpack.c.bf16 %v1966_v35, %v1965_v59 }
 0x4b4   :  { %2400 = vmatpush3.bf16.msra.mxu1 %v2399_v15 }
 0x4b5   :  { %2401 = vmatprep.subr.bf16.mxu1 %v2755_v17  ;;  %v2053_v17 = vstv %s3790_s9 }
 0x4b8   :  { %2403 = vmatpush3.bf16.msra.mxu1 %v2402_v9 }
 0x4bb   :  { %2378 = vmatmul.mubr.f32.vlgmr.msra.gmra.mrb[80].mxu1 %v1969_v53 }
 0x58e   :  { %v2036_v23 = vpop.f32.mrb[80].mxu1 }
 0x58f   :  { %v2047_v48 = vmul.f32 %v2231_v11, %v2036_v23  ;;  %v2379_v43 = vpop.f32.mrb[81].mxu1 }
 0x591   :  { %v2049_v49 = vsel %vm2048_vm1, %v2047_v48, 0.0 }
 0x592   :  { %2050 = vadd.xlane.f32.xlu0 %v2049_v49 }
 0x61f   :  { %v2051_v54 = vpop.xlane.xlu0 %2050 }
 0x620   :  { %v2054_v63 = vadd.f32 %v2053_v17, %v2051_v54 }
 0x622   :  { %2056 = vst.msk [vmem:[%s3791_s10] sm:$0x3] %vm2055_vm2, %v2054_v63 }

</bundles_post_ra>
